<compile_context>
chip_gen: v5e
topology: v5e:2x2
jax: 0.10.0
libtpu: 0.0.40
codegen_flags: <defaults>
</compile_context>

<pallas_src>
import functools

import jax
import jax.numpy as jnp
from jax import lax
from jax.experimental import pallas as pl
from jax.experimental.pallas import tpu as pltpu

LEAKY_SLOPE = 0.1
EPS = 1e-5
K = 3              # conv2 kernel_size
EXPANSION = 4      # Bottleneck.expansion
# MXU operand dtype.  jnp.bfloat16 gives full-rate MXU + halved VMEM bytes on
# v6e/v7x (accumulation stays f32 via preferred_element_type); kept at f32 here
# so the tight tolerance against the f32 reference holds on every generation.
MATMUL_DTYPE = jnp.float32
# TODO(synk): stride/dilation/downsample are fixed at the module defaults
# (1/1/None); sparse Minkowski coordinate bookkeeping is replaced by a dense
# grid plus an explicit 0/1 validity mask.
# TODO(synk): at realistic channel/spatial sizes add a parallel spatial-row (or
# output-channel) grid axis so the per-step working set fits v7x's 64 MiB VMEM
# and both v7x TensorCores stay busy at small batch.


def _instance_norm(f):
    # MinkowskiInstanceNorm (dense analogue): per-(instance, channel) over all
    # H*W positions, no affine.  Vectorized across channels: one lane reduce.
    mu = jnp.mean(f, axis=-1, keepdims=True)
    var = jnp.mean((f - mu) ** 2, axis=-1, keepdims=True)
    return (f - mu) * lax.rsqrt(var + EPS)


def _leaky_relu(f):
    return jnp.where(f >= 0.0, f, LEAKY_SLOPE * f)


def _bottleneck_kernel(w1_ref, b1_ref, w2_ref, b2_ref, w3_ref, b3_ref,
                       cmask_ref, x_ref, m_ref, out_ref, omask_ref,
                       fflat_ref, mflat_ref, *, c_mid, h, w):
    hw = h * w
    left = w + 1                 # flat offset of interior element (0, 0)
    flat_len = (h + 2) * w + 2   # H-padded flat length (+2 corner guards)

    def mm(wmat, act):           # MXU matmul, f32 accumulation
        return jnp.dot(wmat.astype(MATMUL_DTYPE), act.astype(MATMUL_DTYPE),
                       preferred_element_type=jnp.float32)

    x = x_ref[...]               # (c_in, hw)  f32
    m = m_ref[...]               # (1, hw)     f32 0/1
    valid0 = m > 0.0

    # -------- conv1: 1x1 partial conv (ratio == 1 on a binary mask) ---------
    o1 = jnp.where(valid0, mm(w1_ref[...], x * m) + b1_ref[...], 0.0)
    f1 = _leaky_relu(_instance_norm(o1))          # (c_mid, hw)
    mask1 = m                                     # 1x1 conv keeps the mask

    # -------- conv2: 3x3 partial conv as 9 per-tap MXU matmuls --------------
    # Masked activation computed ONCE and staged into an H-padded flat scratch;
    # each spatial tap is a static lane-offset slice.  The W boundary is handled
    # with a per-column validity mask; only the tiny halo strips are re-zeroed
    # each step (cheap, and safe under any core partitioning of the grid).
    zf = jnp.zeros((c_mid, left), jnp.float32)
    zm = jnp.zeros((1, left), jnp.float32)
    fflat_ref[:, 0:left] = zf
    fflat_ref[:, left + hw:flat_len] = zf
    mflat_ref[:, 0:left] = zm
    mflat_ref[:, left + hw:flat_len] = zm
    fflat_ref[:, left:left + hw] = f1 * mask1
    mflat_ref[:, left:left + hw] = mask1

    cm = cmask_ref[...]                           # (2, hw): [x != 0, x != w-1]
    colmask = {-1: cm[0:1, :], 0: None, 1: cm[1:2, :]}

    acc2 = jnp.zeros((c_mid, hw), jnp.float32)    # single f32 accumulator
    msum2 = jnp.zeros((1, hw), jnp.float32)
    for dy in range(K):
        for dx in range(K):
            oy, ox = dy - 1, dx - 1
            s = left + oy * w + ox                # static lane offset
            mtap = mflat_ref[:, s:s + hw]
            ftap = fflat_ref[:, s:s + hw]
            cmk = colmask[ox]
            if cmk is not None:
                mtap = mtap * cmk
                ftap = ftap * cmk
            msum2 = msum2 + mtap
            acc2 = acc2 + mm(w2_ref[dy * K + dx], ftap)

    valid2 = msum2 > 0.0
    ratio2 = float(K * K) * pl.reciprocal(jnp.where(valid2, msum2, 1.0),
                                          approx=True)
    o2 = jnp.where(valid2, acc2 * ratio2 + b2_ref[...], 0.0)
    f2 = _leaky_relu(_instance_norm(o2))
    mask2 = valid2.astype(jnp.float32)

    # -------- conv3: 1x1 partial conv ----------------------------------------
    o3 = jnp.where(valid2, mm(w3_ref[...], f2 * mask2) + b3_ref[...], 0.0)
    f3 = _instance_norm(o3)

    # -------- residual (+ LeakyReLU) and mask update -------------------------
    res = f3 + x                                  # inplanes == planes*expansion
    out_ref[...] = _leaky_relu(res)
    omask_ref[...] = jnp.clip(mask2 + m, 0.0, 1.0)


def bottleneck_pallas(x, mask, w1, b1, w2, b2, w3, b3):
    n, c_in, h, w = x.shape
    c_mid = w1.shape[0]
    c_out = w3.shape[0]
    assert w1.shape == (c_mid, c_in, 1, 1)
    assert w2.shape == (c_mid, c_mid, K, K)
    assert w3.shape == (c_out, c_mid, 1, 1)
    assert c_out == c_in, "downsample=None requires inplanes == planes*expansion"
    hw = h * w
    flat_len = (h + 2) * w + 2
    f32 = jnp.float32

    # contiguous reshapes only -- no wrapper-side padding / copies of x or mask
    x2 = x.reshape(n, c_in, hw).astype(f32)
    m2 = mask.reshape(n, 1, hw).astype(f32)
    w1m = w1.reshape(c_mid, c_in).astype(f32)
    w3m = w3.reshape(c_out, c_mid).astype(f32)
    # conv2 weights as K*K per-tap (C_out, C_in) matrices, resident in VMEM
    w2t = jnp.transpose(w2, (2, 3, 0, 1)).reshape(K * K, c_mid, c_mid).astype(f32)
    b1c = b1.reshape(c_mid, 1).astype(f32)
    b2c = b2.reshape(c_mid, 1).astype(f32)
    b3c = b3.reshape(c_out, 1).astype(f32)
    # static per-column validity masks for the +/-1 horizontal taps
    col = jnp.tile(jnp.arange(w), (h,))
    cmask = jnp.stack([(col != 0), (col != w - 1)]).astype(f32)   # (2, hw)

    kern = functools.partial(_bottleneck_kernel, c_mid=c_mid, h=h, w=w)

    def full(shape):
        return pl.BlockSpec(shape, lambda *_: (0,) * len(shape))

    out, omask = pl.pallas_call(
        kern,
        out_shape=(jax.ShapeDtypeStruct((n, c_out, hw), f32),
                   jax.ShapeDtypeStruct((n, 1, hw), f32)),
        grid=(n,),
        in_specs=[full((c_mid, c_in)), full((c_mid, 1)),
                  full((K * K, c_mid, c_mid)), full((c_mid, 1)),
                  full((c_out, c_mid)), full((c_out, 1)),
                  full((2, hw)),
                  pl.BlockSpec((None, c_in, hw), lambda i: (i, 0, 0)),
                  pl.BlockSpec((None, 1, hw), lambda i: (i, 0, 0))],
        out_specs=(pl.BlockSpec((None, c_out, hw), lambda i: (i, 0, 0)),
                   pl.BlockSpec((None, 1, hw), lambda i: (i, 0, 0))),
        scratch_shapes=[pltpu.VMEM((c_mid, flat_len), f32),
                        pltpu.VMEM((1, flat_len), f32)],
        compiler_params=pltpu.CompilerParams(
            dimension_semantics=("parallel",),
            vmem_limit_bytes=32 * 1024 * 1024),
    )(w1m, b1c, w2t, b2c, w3m, b3c, cmask, x2, m2)
    return out.reshape(n, c_out, h, w), omask.reshape(n, h, w)


def _reference(x, mask, w1, b1, w2, b2, w3, b3):
    """Pure-JAX reference with identical (dense partial-conv) semantics."""
    m = mask[:, None, :, :]
    dn = ('NCHW', 'OIHW', 'NCHW')

    def pconv(f, m, wgt, b, k):
        pad = (k - 1) // 2
        conv = lax.conv_general_dilated(f * m, wgt, (1, 1),
                                        ((pad, pad), (pad, pad)),
                                        dimension_numbers=dn,
                                        precision=lax.Precision.HIGHEST)
        ones = jnp.ones((1, 1, k, k), f.dtype)
        msum = lax.conv_general_dilated(m, ones, (1, 1),
                                        ((pad, pad), (pad, pad)),
                                        dimension_numbers=dn,
                                        precision=lax.Precision.HIGHEST)
        valid = msum > 0
        ratio = jnp.where(valid, (k * k) / jnp.where(valid, msum, 1.0), 0.0)
        out = jnp.where(valid, conv * ratio + b[None, :, None, None], 0.0)
        return out, valid.astype(f.dtype)

    def inorm(f):
        mu = f.mean(axis=(2, 3), keepdims=True)
        var = ((f - mu) ** 2).mean(axis=(2, 3), keepdims=True)
        return (f - mu) * lax.rsqrt(var + EPS)

    def lrelu(f):
        return jnp.where(f >= 0, f, LEAKY_SLOPE * f)

    out, om = pconv(x, m, w1, b1, 1)
    out = lrelu(inorm(out))
    out, om = pconv(out, om, w2, b2, K)
    out = lrelu(inorm(out))
    out, om = pconv(out, om, w3, b3, 1)
    out = inorm(out)
    out = lrelu(out + x)
    om = jnp.clip(om + m, 0.0, 1.0)
    return out, om[:, 0]


if __name__ == "__main__":
    key = jax.random.PRNGKey(0)
    kx, km, k1, kb1, k2, kb2, k3, kb3 = jax.random.split(key, 8)
    N, PLANES, H, W_SP = 2, 8, 16, 16
    C_IN = PLANES * EXPANSION      # inplanes == planes*expansion (downsample=None)
    C_OUT = PLANES * EXPANSION

    x = jax.random.normal(kx, (N, C_IN, H, W_SP), jnp.float32)
    mask = (jax.random.uniform(km, (N, H, W_SP)) > 0.3).astype(jnp.float32)
    w1 = 0.2 * jax.random.normal(k1, (PLANES, C_IN, 1, 1), jnp.float32)
    b1 = 0.1 * jax.random.normal(kb1, (PLANES,), jnp.float32)
    w2 = 0.2 * jax.random.normal(k2, (PLANES, PLANES, K, K), jnp.float32)
    b2 = 0.1 * jax.random.normal(kb2, (PLANES,), jnp.float32)
    w3 = 0.2 * jax.random.normal(k3, (C_OUT, PLANES, 1, 1), jnp.float32)
    b3 = 0.1 * jax.random.normal(kb3, (C_OUT,), jnp.float32)

    out, omask = jax.block_until_ready(
        bottleneck_pallas(x, mask, w1, b1, w2, b2, w3, b3))

    ref_out, ref_mask = _reference(x, mask, w1, b1, w2, b2, w3, b3)
    assert out.shape == (N, C_OUT, H, W_SP) and omask.shape == (N, H, W_SP)
    # tolerance accounts for MXU accumulation + approx-EUP reciprocal in ratio
    assert jnp.allclose(out, ref_out, atol=5e-3, rtol=5e-3), "feature mismatch"
    assert jnp.allclose(omask, ref_mask), "mask mismatch"
    print("KERNEL_OK")
</pallas_src>

<mosaic_0001>
module attributes {stable_mosaic.version = 11 : i64} {
  func.func @_bottleneck_kernel(%arg0: i32, %arg1: memref<8x32xf32, #tpu.memory_space<vmem>>, %arg2: memref<8x1xf32, #tpu.memory_space<vmem>>, %arg3: memref<9x8x8xf32, #tpu.memory_space<vmem>>, %arg4: memref<8x1xf32, #tpu.memory_space<vmem>>, %arg5: memref<32x8xf32, #tpu.memory_space<vmem>>, %arg6: memref<32x1xf32, #tpu.memory_space<vmem>>, %arg7: memref<2x256xf32, #tpu.memory_space<vmem>>, %arg8: memref<1x32x256xf32, #tpu.memory_space<vmem>>, %arg9: memref<1x1x256xf32, #tpu.memory_space<vmem>>, %arg10: memref<1x32x256xf32, #tpu.memory_space<vmem>>, %arg11: memref<1x1x256xf32, #tpu.memory_space<vmem>>, %arg12: memref<8x290xf32, #tpu.memory_space<vmem>>, %arg13: memref<1x290xf32, #tpu.memory_space<vmem>>) attributes {dimension_semantics = [#tpu.dimension_semantics<parallel>], iteration_bounds = array<i64: 2>, scalar_prefetch = 0 : i64, scratch_operands = 2 : i64, tpu.core_type = #tpu.core_type<tc>, window_params = [{pipeline_mode = #tpu.pipeline_mode<synchronous>, transform_indices = @transform_0, window_bounds = array<i64: 8, 32>}, {pipeline_mode = #tpu.pipeline_mode<synchronous>, transform_indices = @transform_1, window_bounds = array<i64: 8, 1>}, {pipeline_mode = #tpu.pipeline_mode<synchronous>, transform_indices = @transform_2, window_bounds = array<i64: 9, 8, 8>}, {pipeline_mode = #tpu.pipeline_mode<synchronous>, transform_indices = @transform_3, window_bounds = array<i64: 8, 1>}, {pipeline_mode = #tpu.pipeline_mode<synchronous>, transform_indices = @transform_4, window_bounds = array<i64: 32, 8>}, {pipeline_mode = #tpu.pipeline_mode<synchronous>, transform_indices = @transform_5, window_bounds = array<i64: 32, 1>}, {pipeline_mode = #tpu.pipeline_mode<synchronous>, transform_indices = @transform_6, window_bounds = array<i64: 2, 256>}, {transform_indices = @transform_7, window_bounds = array<i64: 1, 32, 256>}, {transform_indices = @transform_8, window_bounds = array<i64: 1, 1, 256>}, {transform_indices = @transform_9, window_bounds = array<i64: 1, 32, 256>}, {transform_indices = @transform_10, window_bounds = array<i64: 1, 1, 256>}]} {
    %c0 = arith.constant 0 : index
    %c0_0 = arith.constant 0 : index
    %c0_1 = arith.constant 0 : index
    %0 = vector.load %arg8[%c0, %c0_0, %c0_1] : memref<1x32x256xf32, #tpu.memory_space<vmem>>, vector<1x32x256xf32>
    %1 = vector.shape_cast %0 : vector<1x32x256xf32> to vector<32x256xf32>
    %c0_2 = arith.constant 0 : index
    %c0_3 = arith.constant 0 : index
    %c0_4 = arith.constant 0 : index
    %2 = vector.load %arg9[%c0_2, %c0_3, %c0_4] : memref<1x1x256xf32, #tpu.memory_space<vmem>>, vector<1x1x256xf32>
    %3 = vector.shape_cast %2 : vector<1x1x256xf32> to vector<1x256xf32>
    %cst = arith.constant 0.000000e+00 : f32
    %4 = vector.broadcast %cst : f32 to vector<1x256xf32>
    %5 = arith.cmpf ogt, %3, %4 : vector<1x256xf32>
    %c0_5 = arith.constant 0 : index
    %c0_6 = arith.constant 0 : index
    %6 = vector.load %arg1[%c0_5, %c0_6] : memref<8x32xf32, #tpu.memory_space<vmem>>, vector<8x32xf32>
    %7 = vector.broadcast %3 : vector<1x256xf32> to vector<32x256xf32>
    %8 = arith.mulf %1, %7 : vector<32x256xf32>
    %cst_7 = arith.constant dense<0.000000e+00> : vector<8x256xf32>
    %9 = tpu.matmul %6, %8, %cst_7 {dimension_numbers = #tpu.dot_dimension_numbers<[1], [0], [0], [1], [0, 0, 1, 1], [], []>} : vector<8x32xf32>, vector<32x256xf32>, vector<8x256xf32> -> vector<8x256xf32>
    %c0_8 = arith.constant 0 : index
    %c0_9 = arith.constant 0 : index
    %10 = vector.load %arg2[%c0_8, %c0_9] : memref<8x1xf32, #tpu.memory_space<vmem>>, vector<8x1xf32>
    %11 = vector.broadcast %10 : vector<8x1xf32> to vector<8x256xf32>
    %12 = arith.addf %9, %11 : vector<8x256xf32>
    %cst_10 = arith.constant 0.000000e+00 : f32
    %13 = vector.shape_cast %5 : vector<1x256xi1> to vector<1x256xi1>
    %14 = vector.broadcast %13 : vector<1x256xi1> to vector<8x256xi1>
    %15 = vector.broadcast %cst_10 : f32 to vector<8x256xf32>
    %16 = arith.select %14, %12, %15 : vector<8x256xi1>, vector<8x256xf32>
    %cst_11 = arith.constant dense<0.000000e+00> : vector<8xf32>
    %17 = vector.multi_reduction <add>, %16, %cst_11 [1] : vector<8x256xf32> to vector<8xf32>
    %18 = vector.shape_cast %17 : vector<8xf32> to vector<8x1xf32>
    %cst_12 = arith.constant 2.560000e+02 : f32
    %19 = vector.broadcast %cst_12 : f32 to vector<8x1xf32>
    %20 = arith.divf %18, %19 : vector<8x1xf32>
    %21 = vector.broadcast %20 : vector<8x1xf32> to vector<8x256xf32>
    %22 = arith.subf %16, %21 : vector<8x256xf32>
    %23 = arith.mulf %22, %22 : vector<8x256xf32>
    %cst_13 = arith.constant dense<0.000000e+00> : vector<8xf32>
    %24 = vector.multi_reduction <add>, %23, %cst_13 [1] : vector<8x256xf32> to vector<8xf32>
    %25 = vector.shape_cast %24 : vector<8xf32> to vector<8x1xf32>
    %cst_14 = arith.constant 2.560000e+02 : f32
    %26 = vector.broadcast %cst_14 : f32 to vector<8x1xf32>
    %27 = arith.divf %25, %26 : vector<8x1xf32>
    %28 = vector.broadcast %20 : vector<8x1xf32> to vector<8x256xf32>
    %29 = arith.subf %16, %28 : vector<8x256xf32>
    %cst_15 = arith.constant 9.99999974E-6 : f32
    %30 = vector.broadcast %cst_15 : f32 to vector<8x1xf32>
    %31 = arith.addf %27, %30 : vector<8x1xf32>
    %32 = math.rsqrt %31 : vector<8x1xf32>
    %33 = vector.broadcast %32 : vector<8x1xf32> to vector<8x256xf32>
    %34 = arith.mulf %29, %33 : vector<8x256xf32>
    %cst_16 = arith.constant 0.000000e+00 : f32
    %35 = vector.broadcast %cst_16 : f32 to vector<8x256xf32>
    %36 = arith.cmpf oge, %34, %35 : vector<8x256xf32>
    %cst_17 = arith.constant 1.000000e-01 : f32
    %37 = vector.broadcast %cst_17 : f32 to vector<8x256xf32>
    %38 = arith.mulf %37, %34 : vector<8x256xf32>
    %39 = arith.select %36, %34, %38 : vector<8x256xi1>, vector<8x256xf32>
    %cst_18 = arith.constant 0.000000e+00 : f32
    %40 = vector.broadcast %cst_18 : f32 to vector<8x17xf32>
    %cst_19 = arith.constant 0.000000e+00 : f32
    %41 = vector.broadcast %cst_19 : f32 to vector<1x17xf32>
    %c0_20 = arith.constant 0 : index
    %c0_21 = arith.constant 0 : index
    %42 = vector.load %arg12[%c0_20, %c0_21] : memref<8x290xf32, #tpu.memory_space<vmem>>, vector<8x17xf32>
    tpu.vector_store %arg12[%c0_20, %c0_21], %40 {strides = array<i32>} : memref<8x290xf32, #tpu.memory_space<vmem>>, vector<8x17xf32>,
    %c0_22 = arith.constant 0 : index
    %c273 = arith.constant 273 : index
    %43 = vector.load %arg12[%c0_22, %c273] : memref<8x290xf32, #tpu.memory_space<vmem>>, vector<8x17xf32>
    tpu.vector_store %arg12[%c0_22, %c273], %40 {strides = array<i32>} : memref<8x290xf32, #tpu.memory_space<vmem>>, vector<8x17xf32>,
    %c0_23 = arith.constant 0 : index
    %c0_24 = arith.constant 0 : index
    %44 = vector.load %arg13[%c0_23, %c0_24] : memref<1x290xf32, #tpu.memory_space<vmem>>, vector<1x17xf32>
    tpu.vector_store %arg13[%c0_23, %c0_24], %41 {strides = array<i32>} : memref<1x290xf32, #tpu.memory_space<vmem>>, vector<1x17xf32>,
    %c0_25 = arith.constant 0 : index
    %c273_26 = arith.constant 273 : index
    %45 = vector.load %arg13[%c0_25, %c273_26] : memref<1x290xf32, #tpu.memory_space<vmem>>, vector<1x17xf32>
    tpu.vector_store %arg13[%c0_25, %c273_26], %41 {strides = array<i32>} : memref<1x290xf32, #tpu.memory_space<vmem>>, vector<1x17xf32>,
    %46 = vector.broadcast %3 : vector<1x256xf32> to vector<8x256xf32>
    %47 = arith.mulf %39, %46 : vector<8x256xf32>
    %c0_27 = arith.constant 0 : index
    %c17 = arith.constant 17 : index
    %48 = vector.load %arg12[%c0_27, %c17] : memref<8x290xf32, #tpu.memory_space<vmem>>, vector<8x256xf32>
    tpu.vector_store %arg12[%c0_27, %c17], %47 {strides = array<i32>} : memref<8x290xf32, #tpu.memory_space<vmem>>, vector<8x256xf32>,
    %c0_28 = arith.constant 0 : index
    %c17_29 = arith.constant 17 : index
    %49 = vector.load %arg13[%c0_28, %c17_29] : memref<1x290xf32, #tpu.memory_space<vmem>>, vector<1x256xf32>
    tpu.vector_store %arg13[%c0_28, %c17_29], %3 {strides = array<i32>} : memref<1x290xf32, #tpu.memory_space<vmem>>, vector<1x256xf32>,
    %c0_30 = arith.constant 0 : index
    %c0_31 = arith.constant 0 : index
    %50 = vector.load %arg7[%c0_30, %c0_31] : memref<2x256xf32, #tpu.memory_space<vmem>>, vector<2x256xf32>
    %51 = vector.extract_strided_slice %50 {offsets = [0, 0], sizes = [1, 256], strides = [1, 1]} : vector<2x256xf32> to vector<1x256xf32>
    %52 = vector.extract_strided_slice %50 {offsets = [1, 0], sizes = [1, 256], strides = [1, 1]} : vector<2x256xf32> to vector<1x256xf32>
    %cst_32 = arith.constant 0.000000e+00 : f32
    %53 = vector.broadcast %cst_32 : f32 to vector<8x256xf32>
    %cst_33 = arith.constant 0.000000e+00 : f32
    %54 = vector.broadcast %cst_33 : f32 to vector<1x256xf32>
    %c0_34 = arith.constant 0 : index
    %c0_35 = arith.constant 0 : index
    %55 = vector.load %arg13[%c0_34, %c0_35] : memref<1x290xf32, #tpu.memory_space<vmem>>, vector<1x256xf32>
    %c0_36 = arith.constant 0 : index
    %c0_37 = arith.constant 0 : index
    %56 = vector.load %arg12[%c0_36, %c0_37] : memref<8x290xf32, #tpu.memory_space<vmem>>, vector<8x256xf32>
    %57 = arith.mulf %55, %51 : vector<1x256xf32>
    %58 = vector.broadcast %51 : vector<1x256xf32> to vector<8x256xf32>
    %59 = arith.mulf %56, %58 : vector<8x256xf32>
    %60 = arith.addf %54, %57 : vector<1x256xf32>
    %c0_38 = arith.constant 0 : index
    %c0_39 = arith.constant 0 : index
    %c0_40 = arith.constant 0 : index
    %61 = vector.load %arg3[%c0_38, %c0_39, %c0_40] : memref<9x8x8xf32, #tpu.memory_space<vmem>>, vector<1x8x8xf32>
    %62 = vector.shape_cast %61 : vector<1x8x8xf32> to vector<8x8xf32>
    %cst_41 = arith.constant dense<0.000000e+00> : vector<8x256xf32>
    %63 = tpu.matmul %62, %59, %cst_41 {dimension_numbers = #tpu.dot_dimension_numbers<[1], [0], [0], [1], [0, 0, 1, 1], [], []>} : vector<8x8xf32>, vector<8x256xf32>, vector<8x256xf32> -> vector<8x256xf32>
    %64 = arith.addf %53, %63 : vector<8x256xf32>
    %c0_42 = arith.constant 0 : index
    %c1 = arith.constant 1 : index
    %65 = vector.load %arg13[%c0_42, %c1] : memref<1x290xf32, #tpu.memory_space<vmem>>, vector<1x256xf32>
    %c0_43 = arith.constant 0 : index
    %c1_44 = arith.constant 1 : index
    %66 = vector.load %arg12[%c0_43, %c1_44] : memref<8x290xf32, #tpu.memory_space<vmem>>, vector<8x256xf32>
    %67 = arith.addf %60, %65 : vector<1x256xf32>
    %c1_45 = arith.constant 1 : index
    %c0_46 = arith.constant 0 : index
    %c0_47 = arith.constant 0 : index
    %68 = vector.load %arg3[%c1_45, %c0_46, %c0_47] : memref<9x8x8xf32, #tpu.memory_space<vmem>>, vector<1x8x8xf32>
    %69 = vector.shape_cast %68 : vector<1x8x8xf32> to vector<8x8xf32>
    %cst_48 = arith.constant dense<0.000000e+00> : vector<8x256xf32>
    %70 = tpu.matmul %69, %66, %cst_48 {dimension_numbers = #tpu.dot_dimension_numbers<[1], [0], [0], [1], [0, 0, 1, 1], [], []>} : vector<8x8xf32>, vector<8x256xf32>, vector<8x256xf32> -> vector<8x256xf32>
    %71 = arith.addf %64, %70 : vector<8x256xf32>
    %c0_49 = arith.constant 0 : index
    %c2 = arith.constant 2 : index
    %72 = vector.load %arg13[%c0_49, %c2] : memref<1x290xf32, #tpu.memory_space<vmem>>, vector<1x256xf32>
    %c0_50 = arith.constant 0 : index
    %c2_51 = arith.constant 2 : index
    %73 = vector.load %arg12[%c0_50, %c2_51] : memref<8x290xf32, #tpu.memory_space<vmem>>, vector<8x256xf32>
    %74 = arith.mulf %72, %52 : vector<1x256xf32>
    %75 = vector.broadcast %52 : vector<1x256xf32> to vector<8x256xf32>
    %76 = arith.mulf %73, %75 : vector<8x256xf32>
    %77 = arith.addf %67, %74 : vector<1x256xf32>
    %c2_52 = arith.constant 2 : index
    %c0_53 = arith.constant 0 : index
    %c0_54 = arith.constant 0 : index
    %78 = vector.load %arg3[%c2_52, %c0_53, %c0_54] : memref<9x8x8xf32, #tpu.memory_space<vmem>>, vector<1x8x8xf32>
    %79 = vector.shape_cast %78 : vector<1x8x8xf32> to vector<8x8xf32>
    %cst_55 = arith.constant dense<0.000000e+00> : vector<8x256xf32>
    %80 = tpu.matmul %79, %76, %cst_55 {dimension_numbers = #tpu.dot_dimension_numbers<[1], [0], [0], [1], [0, 0, 1, 1], [], []>} : vector<8x8xf32>, vector<8x256xf32>, vector<8x256xf32> -> vector<8x256xf32>
    %81 = arith.addf %71, %80 : vector<8x256xf32>
    %c0_56 = arith.constant 0 : index
    %c16 = arith.constant 16 : index
    %82 = vector.load %arg13[%c0_56, %c16] : memref<1x290xf32, #tpu.memory_space<vmem>>, vector<1x256xf32>
    %c0_57 = arith.constant 0 : index
    %c16_58 = arith.constant 16 : index
    %83 = vector.load %arg12[%c0_57, %c16_58] : memref<8x290xf32, #tpu.memory_space<vmem>>, vector<8x256xf32>
    %84 = arith.mulf %82, %51 : vector<1x256xf32>
    %85 = vector.broadcast %51 : vector<1x256xf32> to vector<8x256xf32>
    %86 = arith.mulf %83, %85 : vector<8x256xf32>
    %87 = arith.addf %77, %84 : vector<1x256xf32>
    %c3 = arith.constant 3 : index
    %c0_59 = arith.constant 0 : index
    %c0_60 = arith.constant 0 : index
    %88 = vector.load %arg3[%c3, %c0_59, %c0_60] : memref<9x8x8xf32, #tpu.memory_space<vmem>>, vector<1x8x8xf32>
    %89 = vector.shape_cast %88 : vector<1x8x8xf32> to vector<8x8xf32>
    %cst_61 = arith.constant dense<0.000000e+00> : vector<8x256xf32>
    %90 = tpu.matmul %89, %86, %cst_61 {dimension_numbers = #tpu.dot_dimension_numbers<[1], [0], [0], [1], [0, 0, 1, 1], [], []>} : vector<8x8xf32>, vector<8x256xf32>, vector<8x256xf32> -> vector<8x256xf32>
    %91 = arith.addf %81, %90 : vector<8x256xf32>
    %c0_62 = arith.constant 0 : index
    %c17_63 = arith.constant 17 : index
    %92 = vector.load %arg13[%c0_62, %c17_63] : memref<1x290xf32, #tpu.memory_space<vmem>>, vector<1x256xf32>
    %c0_64 = arith.constant 0 : index
    %c17_65 = arith.constant 17 : index
    %93 = vector.load %arg12[%c0_64, %c17_65] : memref<8x290xf32, #tpu.memory_space<vmem>>, vector<8x256xf32>
    %94 = arith.addf %87, %92 : vector<1x256xf32>
    %c4 = arith.constant 4 : index
    %c0_66 = arith.constant 0 : index
    %c0_67 = arith.constant 0 : index
    %95 = vector.load %arg3[%c4, %c0_66, %c0_67] : memref<9x8x8xf32, #tpu.memory_space<vmem>>, vector<1x8x8xf32>
    %96 = vector.shape_cast %95 : vector<1x8x8xf32> to vector<8x8xf32>
    %cst_68 = arith.constant dense<0.000000e+00> : vector<8x256xf32>
    %97 = tpu.matmul %96, %93, %cst_68 {dimension_numbers = #tpu.dot_dimension_numbers<[1], [0], [0], [1], [0, 0, 1, 1], [], []>} : vector<8x8xf32>, vector<8x256xf32>, vector<8x256xf32> -> vector<8x256xf32>
    %98 = arith.addf %91, %97 : vector<8x256xf32>
    %c0_69 = arith.constant 0 : index
    %c18 = arith.constant 18 : index
    %99 = vector.load %arg13[%c0_69, %c18] : memref<1x290xf32, #tpu.memory_space<vmem>>, vector<1x256xf32>
    %c0_70 = arith.constant 0 : index
    %c18_71 = arith.constant 18 : index
    %100 = vector.load %arg12[%c0_70, %c18_71] : memref<8x290xf32, #tpu.memory_space<vmem>>, vector<8x256xf32>
    %101 = arith.mulf %99, %52 : vector<1x256xf32>
    %102 = vector.broadcast %52 : vector<1x256xf32> to vector<8x256xf32>
    %103 = arith.mulf %100, %102 : vector<8x256xf32>
    %104 = arith.addf %94, %101 : vector<1x256xf32>
    %c5 = arith.constant 5 : index
    %c0_72 = arith.constant 0 : index
    %c0_73 = arith.constant 0 : index
    %105 = vector.load %arg3[%c5, %c0_72, %c0_73] : memref<9x8x8xf32, #tpu.memory_space<vmem>>, vector<1x8x8xf32>
    %106 = vector.shape_cast %105 : vector<1x8x8xf32> to vector<8x8xf32>
    %cst_74 = arith.constant dense<0.000000e+00> : vector<8x256xf32>
    %107 = tpu.matmul %106, %103, %cst_74 {dimension_numbers = #tpu.dot_dimension_numbers<[1], [0], [0], [1], [0, 0, 1, 1], [], []>} : vector<8x8xf32>, vector<8x256xf32>, vector<8x256xf32> -> vector<8x256xf32>
    %108 = arith.addf %98, %107 : vector<8x256xf32>
    %c0_75 = arith.constant 0 : index
    %c32 = arith.constant 32 : index
    %109 = vector.load %arg13[%c0_75, %c32] : memref<1x290xf32, #tpu.memory_space<vmem>>, vector<1x256xf32>
    %c0_76 = arith.constant 0 : index
    %c32_77 = arith.constant 32 : index
    %110 = vector.load %arg12[%c0_76, %c32_77] : memref<8x290xf32, #tpu.memory_space<vmem>>, vector<8x256xf32>
    %111 = arith.mulf %109, %51 : vector<1x256xf32>
    %112 = vector.broadcast %51 : vector<1x256xf32> to vector<8x256xf32>
    %113 = arith.mulf %110, %112 : vector<8x256xf32>
    %114 = arith.addf %104, %111 : vector<1x256xf32>
    %c6 = arith.constant 6 : index
    %c0_78 = arith.constant 0 : index
    %c0_79 = arith.constant 0 : index
    %115 = vector.load %arg3[%c6, %c0_78, %c0_79] : memref<9x8x8xf32, #tpu.memory_space<vmem>>, vector<1x8x8xf32>
    %116 = vector.shape_cast %115 : vector<1x8x8xf32> to vector<8x8xf32>
    %cst_80 = arith.constant dense<0.000000e+00> : vector<8x256xf32>
    %117 = tpu.matmul %116, %113, %cst_80 {dimension_numbers = #tpu.dot_dimension_numbers<[1], [0], [0], [1], [0, 0, 1, 1], [], []>} : vector<8x8xf32>, vector<8x256xf32>, vector<8x256xf32> -> vector<8x256xf32>
    %118 = arith.addf %108, %117 : vector<8x256xf32>
    %c0_81 = arith.constant 0 : index
    %c33 = arith.constant 33 : index
    %119 = vector.load %arg13[%c0_81, %c33] : memref<1x290xf32, #tpu.memory_space<vmem>>, vector<1x256xf32>
    %c0_82 = arith.constant 0 : index
    %c33_83 = arith.constant 33 : index
    %120 = vector.load %arg12[%c0_82, %c33_83] : memref<8x290xf32, #tpu.memory_space<vmem>>, vector<8x256xf32>
    %121 = arith.addf %114, %119 : vector<1x256xf32>
    %c7 = arith.constant 7 : index
    %c0_84 = arith.constant 0 : index
    %c0_85 = arith.constant 0 : index
    %122 = vector.load %arg3[%c7, %c0_84, %c0_85] : memref<9x8x8xf32, #tpu.memory_space<vmem>>, vector<1x8x8xf32>
    %123 = vector.shape_cast %122 : vector<1x8x8xf32> to vector<8x8xf32>
    %cst_86 = arith.constant dense<0.000000e+00> : vector<8x256xf32>
    %124 = tpu.matmul %123, %120, %cst_86 {dimension_numbers = #tpu.dot_dimension_numbers<[1], [0], [0], [1], [0, 0, 1, 1], [], []>} : vector<8x8xf32>, vector<8x256xf32>, vector<8x256xf32> -> vector<8x256xf32>
    %125 = arith.addf %118, %124 : vector<8x256xf32>
    %c0_87 = arith.constant 0 : index
    %c34 = arith.constant 34 : index
    %126 = vector.load %arg13[%c0_87, %c34] : memref<1x290xf32, #tpu.memory_space<vmem>>, vector<1x256xf32>
    %c0_88 = arith.constant 0 : index
    %c34_89 = arith.constant 34 : index
    %127 = vector.load %arg12[%c0_88, %c34_89] : memref<8x290xf32, #tpu.memory_space<vmem>>, vector<8x256xf32>
    %128 = arith.mulf %126, %52 : vector<1x256xf32>
    %129 = vector.broadcast %52 : vector<1x256xf32> to vector<8x256xf32>
    %130 = arith.mulf %127, %129 : vector<8x256xf32>
    %131 = arith.addf %121, %128 : vector<1x256xf32>
    %c8 = arith.constant 8 : index
    %c0_90 = arith.constant 0 : index
    %c0_91 = arith.constant 0 : index
    %132 = vector.load %arg3[%c8, %c0_90, %c0_91] : memref<9x8x8xf32, #tpu.memory_space<vmem>>, vector<1x8x8xf32>
    %133 = vector.shape_cast %132 : vector<1x8x8xf32> to vector<8x8xf32>
    %cst_92 = arith.constant dense<0.000000e+00> : vector<8x256xf32>
    %134 = tpu.matmul %133, %130, %cst_92 {dimension_numbers = #tpu.dot_dimension_numbers<[1], [0], [0], [1], [0, 0, 1, 1], [], []>} : vector<8x8xf32>, vector<8x256xf32>, vector<8x256xf32> -> vector<8x256xf32>
    %135 = arith.addf %125, %134 : vector<8x256xf32>
    %cst_93 = arith.constant 0.000000e+00 : f32
    %136 = vector.broadcast %cst_93 : f32 to vector<1x256xf32>
    %137 = arith.cmpf ogt, %131, %136 : vector<1x256xf32>
    %cst_94 = arith.constant 1.000000e+00 : f32
    %138 = vector.broadcast %cst_94 : f32 to vector<1x256xf32>
    %139 = arith.select %137, %131, %138 : vector<1x256xi1>, vector<1x256xf32>
    %140 = tpu.reciprocal %139 {approx = true} : vector<1x256xf32> -> vector<1x256xf32>
    %cst_95 = arith.constant 9.000000e+00 : f32
    %141 = vector.broadcast %cst_95 : f32 to vector<1x256xf32>
    %142 = arith.mulf %141, %140 : vector<1x256xf32>
    %143 = vector.broadcast %142 : vector<1x256xf32> to vector<8x256xf32>
    %144 = arith.mulf %135, %143 : vector<8x256xf32>
    %c0_96 = arith.constant 0 : index
    %c0_97 = arith.constant 0 : index
    %145 = vector.load %arg4[%c0_96, %c0_97] : memref<8x1xf32, #tpu.memory_space<vmem>>, vector<8x1xf32>
    %146 = vector.broadcast %145 : vector<8x1xf32> to vector<8x256xf32>
    %147 = arith.addf %144, %146 : vector<8x256xf32>
    %cst_98 = arith.constant 0.000000e+00 : f32
    %148 = vector.shape_cast %137 : vector<1x256xi1> to vector<1x256xi1>
    %149 = vector.broadcast %148 : vector<1x256xi1> to vector<8x256xi1>
    %150 = vector.broadcast %cst_98 : f32 to vector<8x256xf32>
    %151 = arith.select %149, %147, %150 : vector<8x256xi1>, vector<8x256xf32>
    %cst_99 = arith.constant dense<0.000000e+00> : vector<8xf32>
    %152 = vector.multi_reduction <add>, %151, %cst_99 [1] : vector<8x256xf32> to vector<8xf32>
    %153 = vector.shape_cast %152 : vector<8xf32> to vector<8x1xf32>
    %cst_100 = arith.constant 2.560000e+02 : f32
    %154 = vector.broadcast %cst_100 : f32 to vector<8x1xf32>
    %155 = arith.divf %153, %154 : vector<8x1xf32>
    %156 = vector.broadcast %155 : vector<8x1xf32> to vector<8x256xf32>
    %157 = arith.subf %151, %156 : vector<8x256xf32>
    %158 = arith.mulf %157, %157 : vector<8x256xf32>
    %cst_101 = arith.constant dense<0.000000e+00> : vector<8xf32>
    %159 = vector.multi_reduction <add>, %158, %cst_101 [1] : vector<8x256xf32> to vector<8xf32>
    %160 = vector.shape_cast %159 : vector<8xf32> to vector<8x1xf32>
    %cst_102 = arith.constant 2.560000e+02 : f32
    %161 = vector.broadcast %cst_102 : f32 to vector<8x1xf32>
    %162 = arith.divf %160, %161 : vector<8x1xf32>
    %163 = vector.broadcast %155 : vector<8x1xf32> to vector<8x256xf32>
    %164 = arith.subf %151, %163 : vector<8x256xf32>
    %cst_103 = arith.constant 9.99999974E-6 : f32
    %165 = vector.broadcast %cst_103 : f32 to vector<8x1xf32>
    %166 = arith.addf %162, %165 : vector<8x1xf32>
    %167 = math.rsqrt %166 : vector<8x1xf32>
    %168 = vector.broadcast %167 : vector<8x1xf32> to vector<8x256xf32>
    %169 = arith.mulf %164, %168 : vector<8x256xf32>
    %cst_104 = arith.constant 0.000000e+00 : f32
    %170 = vector.broadcast %cst_104 : f32 to vector<8x256xf32>
    %171 = arith.cmpf oge, %169, %170 : vector<8x256xf32>
    %cst_105 = arith.constant 1.000000e-01 : f32
    %172 = vector.broadcast %cst_105 : f32 to vector<8x256xf32>
    %173 = arith.mulf %172, %169 : vector<8x256xf32>
    %174 = arith.select %171, %169, %173 : vector<8x256xi1>, vector<8x256xf32>
    %175 = arith.extui %137 : vector<1x256xi1> to vector<1x256xi32>
    %176 = arith.sitofp %175 : vector<1x256xi32> to vector<1x256xf32>
    %c0_106 = arith.constant 0 : index
    %c0_107 = arith.constant 0 : index
    %177 = vector.load %arg5[%c0_106, %c0_107] : memref<32x8xf32, #tpu.memory_space<vmem>>, vector<32x8xf32>
    %178 = vector.broadcast %176 : vector<1x256xf32> to vector<8x256xf32>
    %179 = arith.mulf %174, %178 : vector<8x256xf32>
    %cst_108 = arith.constant dense<0.000000e+00> : vector<32x256xf32>
    %180 = tpu.matmul %177, %179, %cst_108 {dimension_numbers = #tpu.dot_dimension_numbers<[1], [0], [0], [1], [0, 0, 1, 1], [], []>} : vector<32x8xf32>, vector<8x256xf32>, vector<32x256xf32> -> vector<32x256xf32>
    %c0_109 = arith.constant 0 : index
    %c0_110 = arith.constant 0 : index
    %181 = vector.load %arg6[%c0_109, %c0_110] : memref<32x1xf32, #tpu.memory_space<vmem>>, vector<32x1xf32>
    %182 = vector.broadcast %181 : vector<32x1xf32> to vector<32x256xf32>
    %183 = arith.addf %180, %182 : vector<32x256xf32>
    %cst_111 = arith.constant 0.000000e+00 : f32
    %184 = vector.shape_cast %137 : vector<1x256xi1> to vector<1x256xi1>
    %185 = vector.broadcast %184 : vector<1x256xi1> to vector<32x256xi1>
    %186 = vector.broadcast %cst_111 : f32 to vector<32x256xf32>
    %187 = arith.select %185, %183, %186 : vector<32x256xi1>, vector<32x256xf32>
    %cst_112 = arith.constant dense<0.000000e+00> : vector<32xf32>
    %188 = vector.multi_reduction <add>, %187, %cst_112 [1] : vector<32x256xf32> to vector<32xf32>
    %189 = vector.shape_cast %188 : vector<32xf32> to vector<32x1xf32>
    %cst_113 = arith.constant 2.560000e+02 : f32
    %190 = vector.broadcast %cst_113 : f32 to vector<32x1xf32>
    %191 = arith.divf %189, %190 : vector<32x1xf32>
    %192 = vector.broadcast %191 : vector<32x1xf32> to vector<32x256xf32>
    %193 = arith.subf %187, %192 : vector<32x256xf32>
    %194 = arith.mulf %193, %193 : vector<32x256xf32>
    %cst_114 = arith.constant dense<0.000000e+00> : vector<32xf32>
    %195 = vector.multi_reduction <add>, %194, %cst_114 [1] : vector<32x256xf32> to vector<32xf32>
    %196 = vector.shape_cast %195 : vector<32xf32> to vector<32x1xf32>
    %cst_115 = arith.constant 2.560000e+02 : f32
    %197 = vector.broadcast %cst_115 : f32 to vector<32x1xf32>
    %198 = arith.divf %196, %197 : vector<32x1xf32>
    %199 = vector.broadcast %191 : vector<32x1xf32> to vector<32x256xf32>
    %200 = arith.subf %187, %199 : vector<32x256xf32>
    %cst_116 = arith.constant 9.99999974E-6 : f32
    %201 = vector.broadcast %cst_116 : f32 to vector<32x1xf32>
    %202 = arith.addf %198, %201 : vector<32x1xf32>
    %203 = math.rsqrt %202 : vector<32x1xf32>
    %204 = vector.broadcast %203 : vector<32x1xf32> to vector<32x256xf32>
    %205 = arith.mulf %200, %204 : vector<32x256xf32>
    %206 = arith.addf %205, %1 : vector<32x256xf32>
    %cst_117 = arith.constant 0.000000e+00 : f32
    %207 = vector.broadcast %cst_117 : f32 to vector<32x256xf32>
    %208 = arith.cmpf oge, %206, %207 : vector<32x256xf32>
    %cst_118 = arith.constant 1.000000e-01 : f32
    %209 = vector.broadcast %cst_118 : f32 to vector<32x256xf32>
    %210 = arith.mulf %209, %206 : vector<32x256xf32>
    %211 = arith.select %208, %206, %210 : vector<32x256xi1>, vector<32x256xf32>
    %c0_119 = arith.constant 0 : index
    %c0_120 = arith.constant 0 : index
    %c0_121 = arith.constant 0 : index
    %212 = vector.load %arg10[%c0_119, %c0_120, %c0_121] : memref<1x32x256xf32, #tpu.memory_space<vmem>>, vector<1x32x256xf32>
    %213 = vector.shape_cast %212 : vector<1x32x256xf32> to vector<32x256xf32>
    %214 = vector.shape_cast %211 : vector<32x256xf32> to vector<1x32x256xf32>
    tpu.vector_store %arg10[%c0_119, %c0_120, %c0_121], %214 {strides = array<i32>} : memref<1x32x256xf32, #tpu.memory_space<vmem>>, vector<1x32x256xf32>,
    %215 = arith.addf %176, %3 : vector<1x256xf32>
    %cst_122 = arith.constant 0.000000e+00 : f32
    %cst_123 = arith.constant 1.000000e+00 : f32
    %216 = vector.broadcast %cst_122 : f32 to vector<1x256xf32>
    %217 = arith.maximumf %216, %215 : vector<1x256xf32>
    %218 = vector.broadcast %cst_123 : f32 to vector<1x256xf32>
    %219 = arith.minimumf %218, %217 : vector<1x256xf32>
    %c0_124 = arith.constant 0 : index
    %c0_125 = arith.constant 0 : index
    %c0_126 = arith.constant 0 : index
    %220 = vector.load %arg11[%c0_124, %c0_125, %c0_126] : memref<1x1x256xf32, #tpu.memory_space<vmem>>, vector<1x1x256xf32>
    %221 = vector.shape_cast %220 : vector<1x1x256xf32> to vector<1x256xf32>
    %222 = vector.shape_cast %219 : vector<1x256xf32> to vector<1x1x256xf32>
    tpu.vector_store %arg11[%c0_124, %c0_125, %c0_126], %222 {strides = array<i32>} : memref<1x1x256xf32, #tpu.memory_space<vmem>>, vector<1x1x256xf32>,
    return
  }
  func.func @transform_0(%arg0: i32) -> (i32, i32) {
    %c0_i32 = arith.constant 0 : i32
    %c0_i32_0 = arith.constant 0 : i32
    %c0_i32_1 = arith.constant 0 : i32
    return %c0_i32, %c0_i32_0 : i32, i32
  }
  func.func @transform_1(%arg0: i32) -> (i32, i32) {
    %c0_i32 = arith.constant 0 : i32
    %c0_i32_0 = arith.constant 0 : i32
    %c0_i32_1 = arith.constant 0 : i32
    return %c0_i32, %c0_i32_0 : i32, i32
  }
  func.func @transform_2(%arg0: i32) -> (i32, i32, i32) {
    %c0_i32 = arith.constant 0 : i32
    %c0_i32_0 = arith.constant 0 : i32
    %c0_i32_1 = arith.constant 0 : i32
    %c0_i32_2 = arith.constant 0 : i32
    return %c0_i32, %c0_i32_0, %c0_i32_1 : i32, i32, i32
  }
  func.func @transform_3(%arg0: i32) -> (i32, i32) {
    %c0_i32 = arith.constant 0 : i32
    %c0_i32_0 = arith.constant 0 : i32
    %c0_i32_1 = arith.constant 0 : i32
    return %c0_i32, %c0_i32_0 : i32, i32
  }
  func.func @transform_4(%arg0: i32) -> (i32, i32) {
    %c0_i32 = arith.constant 0 : i32
    %c0_i32_0 = arith.constant 0 : i32
    %c0_i32_1 = arith.constant 0 : i32
    return %c0_i32, %c0_i32_0 : i32, i32
  }
  func.func @transform_5(%arg0: i32) -> (i32, i32) {
    %c0_i32 = arith.constant 0 : i32
    %c0_i32_0 = arith.constant 0 : i32
    %c0_i32_1 = arith.constant 0 : i32
    return %c0_i32, %c0_i32_0 : i32, i32
  }
  func.func @transform_6(%arg0: i32) -> (i32, i32) {
    %c0_i32 = arith.constant 0 : i32
    %c0_i32_0 = arith.constant 0 : i32
    %c0_i32_1 = arith.constant 0 : i32
    return %c0_i32, %c0_i32_0 : i32, i32
  }
  func.func @transform_7(%arg0: i32) -> (i32, i32, i32) {
    %c0_i32 = arith.constant 0 : i32
    %c0_i32_0 = arith.constant 0 : i32
    %c0_i32_1 = arith.constant 0 : i32
    return %arg0, %c0_i32, %c0_i32_0 : i32, i32, i32
  }
  func.func @transform_8(%arg0: i32) -> (i32, i32, i32) {
    %c0_i32 = arith.constant 0 : i32
    %c0_i32_0 = arith.constant 0 : i32
    %c0_i32_1 = arith.constant 0 : i32
    return %arg0, %c0_i32, %c0_i32_0 : i32, i32, i32
  }
  func.func @transform_9(%arg0: i32) -> (i32, i32, i32) {
    %c0_i32 = arith.constant 0 : i32
    %c0_i32_0 = arith.constant 0 : i32
    %c0_i32_1 = arith.constant 0 : i32
    return %arg0, %c0_i32, %c0_i32_0 : i32, i32, i32
  }
  func.func @transform_10(%arg0: i32) -> (i32, i32, i32) {
    %c0_i32 = arith.constant 0 : i32
    %c0_i32_0 = arith.constant 0 : i32
    %c0_i32_1 = arith.constant 0 : i32
    return %arg0, %c0_i32, %c0_i32_0 : i32, i32, i32
  }
}

</mosaic_0001>

<bundles_post_ra>
// kernel: tpu_custom_call.1
= control target key start
LH: loop header
LB: loop body
LE: loop exit
PB: predicated region body
PF: predicated region fallthrough
CT: control target
= control target key end

     0   :  { %s2588_s0 = inlined_call_operand.vmem [shape: f32[8,32], index: 0, kind: input, shape index: {}]   ;;  %s2589_s1 = inlined_call_operand.vmem [shape: f32[8,1], index: 1, kind: input, shape index: {}]   ;;  %s2590_s2 = inlined_call_operand.vmem [shape: f32[9,8,8], index: 2, kind: input, shape index: {}]   ;;  %s2591_s3 = inlined_call_operand.vmem [shape: f32[8,1], index: 3, kind: input, shape index: {}]   ;;  %s2592_s4 = inlined_call_operand.vmem [shape: f32[32,8], index: 4, kind: input, shape index: {}]   ;;  %s2593_s5 = inlined_call_operand.vmem [shape: f32[32,1], index: 5, kind: input, shape index: {}]   ;;  %s2594_s6 = inlined_call_operand.vmem [shape: f32[2,256], index: 6, kind: input, shape index: {}]   ;;  %s2595_s7 = inlined_call_operand.vmem [shape: f32[2,32,256], index: 7, kind: input, shape index: {}]   ;;  %s2596_s8 = inlined_call_operand.vmem [shape: f32[2,1,256], index: 8, kind: input, shape index: {}]   ;;  %s2597_s9 = inlined_call_operand.hbm [shape: f32[2,32,256], index: 9, kind: output, shape index: {0}]   ;;  %s2598_s10 = inlined_call_operand.hbm [shape: f32[2,1,256], index: 10, kind: output, shape index: {1}]  }
   0x1   :  { %2606 = sst [smem:[#allocation10_spill]] %s2588_s0 }
   0x2   :  { %2607 = sst [smem:[#allocation11_spill]] %s2589_s1 }
   0x3   :  { %2608 = sst [smem:[#allocation12_spill]] %s2590_s2 }
   0x4   :  { %2609 = sst [smem:[#allocation13_spill]] %s2591_s3 }
   0x5   :  { %2610 = sst [smem:[#allocation14_spill]] %s2592_s4 }
   0x6   :  { %2611 = sst [smem:[#allocation15_spill]] %s2593_s5 }
   0x7   :  { %16 = vsyncpa [#allocation5], 0 }
   0x8   :  { %18 = vsyncpa [#allocation5 + $0x1], 0 }
   0x9   :  { %19 = vsyncpa [#allocation7], 0 }
   0xa   :  { %21 = vsyncpa [#allocation7 + $0x1], 0  ;;  %s2083_s13 = smov 0   ;;  %s2085_s14 = smov 0  }
   0xb   :  { %s2087_s15 = smov 0   ;;  %s2089_s16 = smov 0  }
   0xc LB: > { %s2104_s17 = sadd.s32 4294967295, %s2008_s16   ;;  %s1731_s18 = sadd.s32 4294967294, %s2008_s16   ;;  %s2008_s16 = sphi %s2089_s16, %s2636_s16   ;;  %s2004_s15 = sphi %s2087_s15, %s2635_s15   ;;  %s2000_s14 = sphi %s2085_s14, %s2634_s14   ;;  %s1996_s13 = sphi %s2083_s13, %s2633_s13  }
   0xd   : > { %s2108_s19 = sadd.s32 1, %s2008_s16   ;;  %s233_s20 = sadd.s32 1, %s2004_s15 }
   0xe   : > { %s230_s21 = ssub.s32 %s2008_s16, %s2108_s19  ;;  %p243_p0 = scmp.ne.s32.totalorder %s2004_s15, %s2000_s14 }
   0xf   : > { %p231_p1 = scmp.eq.s32.totalorder %s230_s21, 0  ;;  %p244_p2 = scmp.eq.s32.totalorder %s2104_s17, 1 }
  0x10   : > { %p249_p3 = scmp.ne.s32.totalorder %s2000_s14, %s1996_s13  ;;  %p250_p4 = scmp.eq.s32.totalorder %s1731_s18, 1 }
  0x11   : > { %s2119_s22 = scalar_select %p231_p1, %s2004_s15, %s233_s20  }
  0x12   : > { %p2121_p5 = por %p244_p2, %p243_p0  ;;  %p2125_p6 = por %p250_p4, %p249_p3 }
  0x13   : > { %p1734_p7 = scmp.ge.s32.totalorder %s2008_s16, 1  ;;  %p330_p8 = scmp.lt.s32.totalorder %s2008_s16, 3 }
  0x15   : > { %p331_p9 = pnand %p1734_p7, %p330_p8 }
  0x16   : > { %p377_p10 = scmp.lt.s32.totalorder (!%p331_p9), %s2104_s17, 1  ;;  %s2614_s1 = sld [smem:[#allocation11_spill]] (!%p331_p9) }
  0x17   : > { %334 = sbr.rel (%p331_p9) target bundleno = 1588 (0x634), region = 56  ;;  %s2615_s0 = sld [smem:[#allocation10_spill]] (!%p331_p9) }
  0x18   : > { %s2013_s30 = smov (!%p331_p9), 2   ;;  %s2014_s11 = smov (!%p331_p9), 17  }
  0x19   : > { %s2015_s18 = smov (!%p331_p9), 18   ;;  %s2605_s20 = smov (!%p331_p9), 16  }
  0x1a   : > { %s2599_s25 = smov (!%p331_p9), 111   ;;  %s2600_s26 = smov (!%p331_p9), 127  }
  0x1b   : > { %s2616_s2 = sld [smem:[#allocation12_spill]] (!%p331_p9) }
  0x1c   : > { %v410_v0 = vld [vmem:[%s2614_s1] sm:$0xff]  ;;  %v2010_v1 = vmov 0   ;;  %s378_s27 = scalar_select %p377_p10, %s2104_s17, 1  ;;  %vm416_vm0 = vcmask 261120   ;;  %v2011_v33 = vmov 256.0   ;;  %vm507_vm10 = vcmask 277640  }
  0x1d   : > { %1848 = vset.pattern.permute.xlu0 %v2010_v1  ;;  %1889 = vset.pattern.permute.xlu1 %v2010_v1  ;;  %v396_v21 = vld [vmem:[%s2615_s0] sm:$0xff]  ;;  %1890 = vrcp.f32 %v2011_v33  ;;  %vm505_vm11 = vcmask 138240   ;;  %vm530_vm12 = vcmask 1047688   ;;  %vm784_vm13 = vcmask 130048   ;;  %s2623_s3 = sld [smem:[#allocation13_spill]] }
  0x1e   : > { %413 = vperm.xlu0 %1848, %v410_v0   ;;  %s1784_s28 = sshll.u32 %s378_s27, 6  ;;  %s1739_s29 = sshll.u32 %s378_s27, 1  ;;  %v2183_v47 = vld [vmem:[%s2594_s6] sm:$0xf]  ;;  %vm686_vm14 = vcmask 15360   ;;  %vm943_vm15 = vcmask 146432  }
  0x1f   : > { %s2141_s12 = scalar_lea.vmem %s2595_s7, %s1784_s28  ;;  %s385_s21 = scalar_lea.vmem %s2596_s8, %s1739_s29  ;;  %v691_v48 = vperm.slane %v2183_v47, 3  ;;  %680 = vst [vmem:[#allocation1] sm:$0xff] %v2183_v47  ;;  %v690_v50 = vperm.slane %v2183_v47, 1 }
  0x20   : > { %v392_v2 = vld [vmem:[%s2141_s12 + $0x30] sm:$0xff]  ;;  %v2147_v3 = vld [vmem:[%s385_s21] sm:$0x3]  ;;  %v393_v4 = vld [vmem:[%s2141_s12 + $0x38] sm:$0xff]  ;;  %s2012_s29 = smov 34   ;;  %s2017_s21 = smov 32  }
  0x21   : > { %v2151_v5 = vperm.slane %v2147_v3, 0  ;;  %v2154_v6 = vperm.slane %v2147_v3, 1  ;;  %v390_v7 = vld [vmem:[%s2141_s12 + $0x20] sm:$0xff]  ;;  %v391_v8 = vld [vmem:[%s2141_s12 + $0x28] sm:$0xff]  ;;  %v388_v9 = vld [vmem:[%s2141_s12 + $0x10] sm:$0xff]  ;;  %vm395_vm1 = vcmp.gt.f32.partialorder %v2147_v3, 0.0 }
  0x22   : > { %v389_v10 = vld [vmem:[%s2141_s12 + $0x18] sm:$0xff]  ;;  %v386_v15 = vld [vmem:[%s2141_s12] sm:$0xff]  ;;  %v387_v16 = vld [vmem:[%s2141_s12 + $0x8] sm:$0xff]  ;;  %v460_v22 = vsel %vm395_vm1, 1, %v2010_v1  ;;  %v695_v49 = vperm.slane %v691_v48, 1  ;;  %v694_v51 = vperm.slane %v690_v50, 1 }
  0x23   : > { %v408_v11 = vmul.f32 %v2151_v5, %v392_v2  ;;  %v409_v12 = vmul.f32 %v2154_v6, %v393_v4  ;;  %v406_v13 = vmul.f32 %v2151_v5, %v390_v7  ;;  %v407_v14 = vmul.f32 %v2154_v6, %v391_v8  ;;  %v1891_v34 = vpop.eup %1890  ;;  %s2601_s27 = smov 112   ;;  %s2022_s28 = smov 126  }
  0x24   : > { %v404_v17 = vmul.f32 %v2151_v5, %v388_v9  ;;  %v405_v18 = vmul.f32 %v2154_v6, %v389_v10  ;;  %v402_v19 = vmul.f32 %v2151_v5, %v386_v15  ;;  %v403_v20 = vmul.f32 %v2154_v6, %v387_v16  ;;  %698 = vrot.lane.b32.xlu2 %v694_v51, %s2013_s30  ;;  %s2624_s5 = sld [smem:[#allocation15_spill]] }
  0x25   : > { %432 = vmatpush.msra.mxu0 %v408_v11  ;;  %452 = vmatpush.msra.mxu1 %v409_v12  ;;  %v461_v23 = vperm.slane %v460_v22, 0  ;;  %v462_v24 = vperm.slane %v460_v22, 1  ;;  %v471_v35 = vmul.f32 256.0, %v1891_v34  ;;  %vm475_vm4 = vweird.f32 %v1891_v34  ;;  %s2631_s4 = sld [smem:[#allocation14_spill]] }
  0x26   : > { %v558_v10 = vperm.slane %v2183_v47, 0  ;;  %vm1189_vm1 = vcmask 277504  }
  0x27   : > { %433 = vmatpush.msra.mxu0 %v406_v13  ;;  %453 = vmatpush.msra.mxu1 %v407_v14  ;;  %vm463_vm2 = vcmp.eq.s32.totalorder %v461_v23, 1  ;;  %vm464_vm3 = vcmp.eq.s32.totalorder %v462_v24, 1  ;;  %v472_v36 = vsub.f32 1.0, %v471_v35 }
  0x28   : > { %v2198_v11 = vperm.slane %v558_v10, 0 }
  0x29   : > { %434 = vmatpush.msra.mxu0 %v404_v17  ;;  %454 = vmatpush.msra.mxu1 %v405_v18  ;;  %v473_v37 = vmul.f32 %v1891_v34, %v472_v36 }
  0x2b   : > { %435 = vmatpush.msra.mxu0 %v402_v19  ;;  %455 = vmatpush.msra.mxu1 %v403_v20  ;;  %v474_v38 = vadd.f32 %v1891_v34, %v473_v37 }
  0x2c   : > { %1740 = vmatmul.msk.f32.vlgmr.msra.gmra.mxu0 %vm416_vm0, %v396_v21  ;;  %1741 = vmatmul.msk.f32.vlgmr.msra.gmra.mxu1 %vm416_vm0, %v396_v21  ;;  %v2226_v21 = vld [vmem:[#allocation1 + $0x1] ss:$2 sm:$0xff] }
  0x2d   : > { %v2177_v39 = vsel %vm475_vm4, %v1891_v34, %v474_v38  ;;  %937 = vst [vmem:[#allocation1] sm:$0xff] %v2183_v47  ;;  %vm554_vm4 = vcmask 1041408  }
  0x7e   : > { %v699_v13 = vpop.permute.xlu2 %698 }
  0x90   : > { %v414_v25 = vpop.permute.xlu0 %413 }
  0xa9   : > { %v437_v26 = vpop.f32.mrf.mxu0  ;;  %v457_v27 = vpop.f32.mrf.mxu1 }
  0xaa   : > { %v438_v28 = vadd.f32 %v437_v26, %v414_v25  ;;  %v458_v29 = vadd.f32 %v457_v27, %v414_v25 }
  0xac   : > { %v465_v30 = vsel %vm463_vm2, %v438_v28, 0.0  ;;  %v466_v31 = vsel %vm464_vm3, %v458_v29, 0.0  ;;  %vm550_vm2 = vcmask 1040384   ;;  %vm552_vm3 = vcmask 1042434  }
  0xad   : > { %v467_v32 = vadd.f32 %v466_v31, %v465_v30 }
  0xaf   : > { %468 = vadd.xlane.f32.xlu0 %v467_v32 }
  0xc3   : > { %1195 = vrot.lane.b32.xlu0 %v695_v49, %s2012_s29 }
 0x122   : > { %v469_v40 = vpop.xlane.xlu0 %468 }
 0x123   : > { %v477_v41 = vmul.f32 %v2177_v39, %v469_v40 }
 0x125   : > { %v478_v42 = vsub.f32 %v465_v30, %v477_v41  ;;  %v479_v43 = vsub.f32 %v466_v31, %v477_v41  ;;  %v939_v30 = vld [vmem:[#allocation1 + $0x1] ss:$2 sm:$0xff] }
 0x126   : > { %1183 = vst [vmem:[#allocation1] sm:$0xff] %v2183_v47 }
 0x127   : > { %v480_v44 = vmul.f32 %v478_v42, %v478_v42  ;;  %v481_v45 = vmul.f32 %v479_v43, %v479_v43 }
 0x129   : > { %v482_v46 = vadd.f32 %v481_v45, %v480_v44 }
 0x12b   : > { %483 = vadd.xlane.f32.xlu1 %v482_v46 }
 0x135   : > { %v1196_v50 = vpop.permute.xlu0 %1195 }
 0x19e   : > { %v484_v52 = vpop.xlane.xlu1 %483 }
 0x19f   : > { %v485_v53 = vmul.f32 %v484_v52, %v2177_v39 }
 0x1a1   : > { %v486_v54 = vadd.f32 1e-05, %v485_v53 }
 0x1a3   : > { %1892 = vrsqrt.f32 %v486_v54  ;;  %vm493_vm6 = vweird.f32 %v486_v54 }
 0x1a9   : > { %v1893_v55 = vpop.eup %1892 }
 0x1aa   : > { %v488_v56 = vmul.f32 %v1893_v55, %v486_v54  ;;  %vm494_vm5 = vweird.f32 %v1893_v55  ;;  %v547_v54 = vrot.slane %v2183_v47, 1 }
 0x1ab   : > { %vm495_vm7 = vmor %vm493_vm6, %vm494_vm5  ;;  %vm574_vm5 = vcmask 1039360   ;;  %vm593_vm6 = vcmask 64512  }
 0x1ac   : > { %v489_v57 = vmul.f32 %v1893_v55, %v488_v56  ;;  %v549_v56 = vrot.slane %v2183_v47, 3 }
 0x1ae   : > { %v490_v58 = vmul.f32 0.5, %v489_v57 }
 0x1b0   : > { %v491_v59 = vsub.f32 1.5, %v490_v58 }
 0x1b2   : > { %v492_v60 = vmul.f32 %v1893_v55, %v491_v59 }
 0x1b4   : > { %v496_v61 = vsel %vm495_vm7, %v1893_v55, %v492_v60  ;;  %v548_v55 = vrot.slane %v2183_v47, 2  ;;  %v551_v60 = vsel %vm550_vm2, %v2183_v47, %v547_v54  ;;  %vm713_vm7 = vcmask 1031168  }
 0x1b5   : > { %v498_v62 = vmul.f32 %v496_v61, %v479_v43  ;;  %v497_v63 = vmul.f32 %v496_v61, %v478_v42  ;;  %vm873_vm2 = vcmask 908288  }
 0x1b6   : > { %v553_v61 = vsel %vm552_vm3, %v548_v55, %v549_v56  ;;  %vm805_vm3 = vcmask 916480  }
 0x1b7   : > { %vm500_vm8 = vcmp.ge.f32.partialorder %v498_v62, 0.0  ;;  %v502_v0 = vmul.f32 0.1, %v498_v62  ;;  %vm499_vm9 = vcmp.ge.f32.partialorder %v497_v63, 0.0  ;;  %v501_v2 = vmul.f32 0.1, %v497_v63 }
 0x1b9   : > { %v504_v4 = vsel %vm500_vm8, %v498_v62, %v502_v0  ;;  %v503_v7 = vsel %vm499_vm9, %v497_v63, %v501_v2  ;;  %v2275_v62 = vsel %vm554_vm4, %v551_v60, %v553_v61  ;;  %v1185_v0 = vld [vmem:[#allocation1 + $0x1] ss:$2 sm:$0xff]  ;;  %vm2604_vm4 = vcmask 900096   ;;  %v1762_v61 = vld [vmem:[%s2616_s2 + $0x38] sm:$0xff] }
 0x1ba   : > { %v519_v8 = vmul.f32 %v504_v4, %v2154_v6  ;;  %v518_v9 = vmul.f32 %v503_v7, %v2151_v5  ;;  %v559_v5 = vperm.slane %v2183_v47, 2  ;;  %v2018_v6 = vmov 0.0  }
 0x1bb   : > { %508 = vst.msk [vmem:[#allocation2 + $0x10] sm:$0xff] %vm507_vm10, %v2018_v6 }
 0x1bc   : > { %524 = vrot.lane.b32.xlu2 %v519_v8, %s2014_s11  ;;  %522 = vrot.lane.b32.xlu1 %v518_v9, %s2014_s11  ;;  %v2206_v12 = vperm.slane %v559_v5, 0  ;;  %506 = vst.msk [vmem:[#allocation2] sm:$0xff] %vm505_vm11, %v2018_v6 }
 0x1c4   : > { %700 = vrot.lane.b32.xlu2 %v695_v49, %s2013_s30  ;;  %947 = vrot.lane.b32.xlu1 %v694_v51, %s2015_s18 }
 0x1cc   : > { %790 = vrot.lane.b32.xlu2 %v2198_v11, %s2605_s20  ;;  %1036 = vrot.lane.b32.xlu1 %v2198_v11, %s2017_s21 }
 0x1d4   : > { %792 = vrot.lane.b32.xlu2 %v2206_v12, %s2605_s20  ;;  %1193 = vrot.lane.b32.xlu1 %v694_v51, %s2012_s29 }
 0x1dc   : > { %949 = vrot.lane.b32.xlu2 %v695_v49, %s2015_s18 }
 0x1e4   : > { %1038 = vrot.lane.b32.xlu2 %v2206_v12, %s2017_s21 }
 0x216   : > { %v525_v14 = vpop.permute.xlu2 %524 }
 0x217   : > { %533 = vst.msk [vmem:[#allocation2 + $0x10] sm:$0xff] %vm505_vm11, %v525_v14 }
 0x21e   : > { %v2217_v15 = vld [vmem:[#allocation2 + $0x10] sm:$0xff]  ;;  %v701_v16 = vpop.permute.xlu2 %700 }
 0x21f   : > { %886 = vrot.lane.b32.xlu0 %v2217_v15, %s2599_s25  ;;  %587 = vrot.lane.b32.xlu1 %v2217_v15, %s2600_s26  ;;  %v708_v33 = vmul.f32 %v701_v16, %v2217_v15  ;;  %v702_v41 = vsel %vm686_vm14, %v699_v13, %v701_v16  ;;  %v1203_v52 = vmul.f32 %v1196_v50, %v2217_v15 }
 0x226   : > { %v791_v17 = vpop.permute.xlu2 %790 }
 0x22e   : > { %v793_v18 = vpop.permute.xlu2 %792  ;;  %v523_v19 = vpop.permute.xlu1 %522 }
 0x22f   : > { %v2224_v20 = vsel %vm505_vm11, %v523_v19, %v525_v14  ;;  %531 = vst.msk [vmem:[#allocation2] sm:$0xff] %vm530_vm12, %v523_v19  ;;  %v794_v22 = vsel %vm784_vm13, %v791_v17, %v793_v18  ;;  %v800_v34 = vmul.f32 %v793_v18, %v2217_v15  ;;  %v567_v14 = vld [vmem:[%s2616_s2] sm:$0xff]  ;;  %v1747_v19 = vld [vmem:[%s2616_s2 + $0x10] sm:$0xff] }
 0x230   : > { %v799_v28 = vmul.f32 %v794_v22, %v2224_v20  ;;  %v707_v42 = vmul.f32 %v702_v41, %v2224_v20  ;;  %v565_v8 = vmul.f32 %v2206_v12, %v2224_v20 }
 0x236   : > { %v950_v23 = vpop.permute.xlu2 %949  ;;  %v2230_v24 = vld [vmem:[#allocation2] sm:$0xff]  ;;  %v948_v25 = vpop.permute.xlu1 %947 }
 0x237   : > { %v1854_v26 = vpack.i.bf16 %v2224_v20, %v2230_v24  ;;  %v798_v27 = vmul.f32 %v791_v17, %v2230_v24  ;;  %v706_v40 = vmul.f32 %v2230_v24, %v699_v13  ;;  %v957_v43 = vmul.f32 %v950_v23, %v2217_v15  ;;  %v1742_v13 = vld [vmem:[%s2616_s2 + $0x8] sm:$0xff] }
 0x238   : > { %v951_v45 = vsel %vm943_vm15, %v948_v25, %v950_v23  ;;  %v955_v46 = vmul.f32 %v948_v25, %v2230_v24  ;;  %v564_v5 = vmul.f32 %v2230_v24, %v2198_v11 }
 0x239   : > { %1855 = vrot.lane.b32.xlu1 %v1854_v26, %s2599_s25  ;;  %1850 = vrot.lane.b32.xlu2 %v1854_v26, %s2600_s26  ;;  %v1864_v29 = vpack.i.bf16 %v799_v28, %v798_v27  ;;  %s2023_s25 = smov 96   ;;  %v1859_v44 = vpack.i.bf16 %v707_v42, %v706_v40  ;;  %s2024_s26 = smov 110   ;;  %v956_v48 = vmul.f32 %v951_v45, %v2224_v20  ;;  %v1759_v45 = vld [vmem:[%s2616_s2 + $0x30] sm:$0xff] }
 0x23b   : > { %1865 = vrot.lane.b32.xlu0 %v1864_v29, %s2601_s27  ;;  %v1869_v49 = vpack.i.bf16 %v956_v48, %v955_v46 }
 0x23e   : > { %v1039_v31 = vpop.permute.xlu2 %1038  ;;  %v1037_v32 = vpop.permute.xlu1 %1036 }
 0x23f   : > { %v1040_v35 = vsel %vm416_vm0, %v1037_v32, %v1039_v31  ;;  %v1044_v36 = vmul.f32 %v1037_v32, %v2230_v24  ;;  %v1046_v53 = vmul.f32 %v1039_v31, %v2217_v15 }
 0x240   : > { %v1045_v37 = vmul.f32 %v1040_v35, %v2224_v20 }
 0x241   : > { %726 = vrot.lane.b32.xlu1 %v708_v33, %s2022_s28  ;;  %818 = vrot.lane.b32.xlu2 %v800_v34, %s2601_s27  ;;  %s2602_s27 = smov 95   ;;  %v1750_v33 = vld [vmem:[%s2616_s2 + $0x18] sm:$0xff] }
 0x242   : > { %v1879_v38 = vpack.i.bf16 %v1045_v37, %v1044_v36 }
 0x244   : > { %1880 = vrot.lane.b32.xlu0 %v1879_v38, %s2023_s25 }
 0x246   : > { %v1194_v51 = vpop.permute.xlu1 %1193 }
 0x247   : > { %v1197_v57 = vsel %vm1189_vm1, %v1194_v51, %v1196_v50  ;;  %v1201_v58 = vmul.f32 %v1194_v51, %v2230_v24 }
 0x248   : > { %v1202_v59 = vmul.f32 %v1197_v57, %v2224_v20  ;;  %v509_v20 = vlaneseq  ;;  %v1765_v57 = vld [vmem:[%s2616_s2 + $0x40] sm:$0xff] }
 0x249   : > { %975 = vrot.lane.b32.xlu1 %v957_v43, %s2024_s26  ;;  %1860 = vrot.lane.b32.xlu2 %v1859_v44, %s2022_s28 }
 0x24a   : > { %v1884_v63 = vpack.i.bf16 %v1202_v59, %v1201_v58  ;;  %vm511_vm8 = vcmp.lt.s32.totalorder %v509_v20, 17  ;;  %vm2307_vm9 = vcmp.ge.s32.totalorder %v509_v20, 17  ;;  %vm515_vm10 = vcmp.lt.s32.totalorder %v509_v20, 34 }
 0x24b   : > { %513 = vst.msk [vmem:[#allocation3] sm:$0x1] %vm511_vm8, %v2018_v6  ;;  %vm516_vm12 = vmand %vm2307_vm9, %vm515_vm10  ;;  %vm2603_vm8 = vcmask 785408   ;;  %vm1208_vm10 = vcmask 769024  }
 0x24c   : > { %1132 = vrot.lane.b32.xlu0 %v2217_v15, %s2602_s27  ;;  %517 = vst.msk [vmem:[#allocation3 + $0x2] sm:$0x1] %vm516_vm12, %v2018_v6  ;;  %vm1119_vm12 = vcmask 777216  }
 0x251   : > { %1875 = vrot.lane.b32.xlu1 %v1854_v26, %s2602_s27  ;;  %1870 = vrot.lane.b32.xlu2 %v1869_v49, %s2024_s26  ;;  %s2026_s27 = smov 94   ;;  %v1756_v49 = vld [vmem:[%s2616_s2 + $0x28] sm:$0xff] }
 0x254   : > { %534 = vrot.lane.b32.xlu0 %v2147_v3, %s2014_s11 }
 0x259   : > { %1064 = vrot.lane.b32.xlu2 %v1046_v53, %s2023_s25  ;;  %1221 = vrot.lane.b32.xlu1 %v1203_v52, %s2026_s27 }
 0x25c   : > { %940 = vrot.lane.b32.xlu0 %v939_v30, %s2015_s18  ;;  %v1753_v30 = vld [vmem:[%s2616_s2 + $0x20] sm:$0xff]  ;;  %s2619_s18 = smov 127  }
 0x261   : > { %781 = vrot.lane.b32.xlu1 %v2275_v62, %s2605_s20  ;;  %1885 = vrot.lane.b32.xlu2 %v1884_v63, %s2026_s27  ;;  %s2403_s20 = sand.u32 1, %s2000_s14  }
 0x269   : > { %1186 = vrot.lane.b32.xlu1 %v1185_v0, %s2012_s29  ;;  %683 = vrot.lane.b32.xlu2 %v2226_v21, %s2013_s30  ;;  %s2621_s29 = smov 111   ;;  %s1736_s30 = sshll.u32 %s2403_s20, 1 }
 0x26a   : > { %s2416_s11 = scalar_lea.vmem [#allocation6], %s1736_s30 }
 0x271   : > { %1030 = vrot.lane.b32.xlu2 %v2275_v62, %s2017_s21  ;;  %s2620_s21 = smov 112  }
 0x291   : > { %v588_v7 = vpop.permute.xlu1 %587  ;;  %v887_v17 = vpop.permute.xlu0 %886 }
 0x293   : > { %v1851_v47 = vpop.permute.xlu2 %1850 }
 0x294   : > { %v1853_v2 = vunpack.i.h.bf16 %v1851_v47  ;;  %v1852_v4 = vunpack.i.l.bf16 %v1851_v47 }
 0x296   : > { %v589_v9 = vsel %vm574_vm5, %v1852_v4, %v1853_v2  ;;  %v590_v10 = vsel %vm574_vm5, %v1853_v2, %v588_v7 }
 0x297   : > { %612 = vmatpush.msrb.mxu0 %v589_v9  ;;  %632 = vmatpush.msrb.mxu1 %v590_v10 }
 0x298   : > { %1743 = vmatmul.msk.f32.vlgmr.msrb.gmra.mxu0 %vm593_vm6, %v1742_v13  ;;  %1744 = vmatmul.msk.f32.vlgmr.msrb.gmra.mxu1 %vm593_vm6, %v1742_v13 }
 0x299   : > { %655 = vmatpush.msra.mxu0 %v564_v5  ;;  %675 = vmatpush.msra.mxu1 %v565_v8 }
 0x29b   : > { %v819_v12 = vpop.permute.xlu2 %818 }
 0x2a0   : > { %1745 = vmatmul.msk.f32.vlgmr.msra.gmra.mxu0 %vm593_vm6, %v567_v14  ;;  %1746 = vmatmul.msk.f32.vlgmr.msra.gmra.mxu1 %vm593_vm6, %v567_v14 }
 0x2a3   : > { %v1861_v11 = vpop.permute.xlu2 %1860 }
 0x2a4   : > { %v1863_v15 = vunpack.i.h.bf16 %v1861_v11  ;;  %v1862_v16 = vunpack.i.l.bf16 %v1861_v11 }
 0x2a6   : > { %v728_v18 = vsel %vm713_vm7, %v1862_v16, %v1863_v15 }
 0x2a7   : > { %750 = vmatpush.msrb.mxu0 %v728_v18 }
 0x2a8   : > { %1748 = vmatmul.msk.f32.vlgmr.msrb.gmra.mxu0 %vm593_vm6, %v1747_v19 }
 0x2ab   : > { %v1871_v22 = vpop.permute.xlu2 %1870  ;;  %v1856_v23 = vpop.permute.xlu1 %1855 }
 0x2ac   : > { %v1858_v24 = vunpack.i.h.bf16 %v1856_v23  ;;  %v1857_v25 = vunpack.i.l.bf16 %v1856_v23  ;;  %v1873_v26 = vunpack.i.h.bf16 %v1871_v22  ;;  %v1872_v27 = vunpack.i.l.bf16 %v1871_v22 }
 0x2ad   : > { %v1866_v28 = vpop.permute.xlu0 %1865 }
 0x2ae   : > { %v888_v29 = vsel %vm873_vm2, %v1857_v25, %v1858_v24  ;;  %v1868_v31 = vunpack.i.h.bf16 %v1866_v28  ;;  %v1867_v32 = vunpack.i.l.bf16 %v1866_v28  ;;  %v977_v36 = vsel %vm2604_vm4, %v1872_v27, %v1873_v26 }
 0x2af   : > { %910 = vmatpush.msra.mxu0 %v888_v29  ;;  %v889_v41 = vsel %vm873_vm2, %v1858_v24, %v887_v17 }
 0x2b0   : > { %v820_v34 = vsel %vm805_vm3, %v1867_v32, %v1868_v31  ;;  %v821_v35 = vsel %vm805_vm3, %v1868_v31, %v819_v12  ;;  %1754 = vmatmul.msk.f32.vlgmr.msra.gmra.mxu0 %vm593_vm6, %v1753_v30  ;;  %v1283_v32 = vld [vmem:[%s2623_s3] sm:$0xff]  ;;  %s1934_s3 = scalar_lea.hbm %s2598_s10, 4 }
 0x2b1   : > { %842 = vmatpush.msra.mxu2 %v820_v34  ;;  %862 = vmatpush.msra.mxu3 %v821_v35  ;;  %v1342_v34 = vld [vmem:[%s2624_s5 + $0x8] sm:$0xff]  ;;  %v1343_v35 = vld [vmem:[%s2624_s5 + $0x10] sm:$0xff] }
 0x2b2   : > { %1752 = vmatmul.msk.f32.vlgmr.msra.gmra.mxu3 %vm593_vm6, %v1750_v33  ;;  %1751 = vmatmul.msk.f32.vlgmr.msra.gmra.mxu2 %vm593_vm6, %v1750_v33  ;;  %v1341_v33 = vld [vmem:[%s2624_s5] sm:$0xff] }
 0x2b3   : > { %999 = vmatpush.msrb.mxu2 %v977_v36  ;;  %v1065_v37 = vpop.permute.xlu2 %1064  ;;  %v727_v38 = vpop.permute.xlu1 %726  ;;  %v1344_v36 = vld [vmem:[%s2624_s5 + $0x18] sm:$0xff] }
 0x2b4   : > { %v729_v40 = vsel %vm713_vm7, %v1863_v15, %v727_v38 }
 0x2b5   : > { %770 = vmatpush.msrb.mxu1 %v729_v40 }
 0x2b6   : > { %v1881_v42 = vpop.permute.xlu0 %1880  ;;  %1749 = vmatmul.msk.f32.vlgmr.msrb.gmra.mxu1 %vm593_vm6, %v1747_v19 }
 0x2b7   : > { %930 = vmatpush.msra.mxu1 %v889_v41  ;;  %v1883_v43 = vunpack.i.h.bf16 %v1881_v42  ;;  %v1882_v44 = vunpack.i.l.bf16 %v1881_v42 }
 0x2b9   : > { %v1066_v46 = vsel %vm2603_vm8, %v1882_v44, %v1883_v43  ;;  %v1067_v48 = vsel %vm2603_vm8, %v1883_v43, %v1065_v37  ;;  %vm539_vm8 = vcmp.lt.s32.totalorder %v509_v20, 273 }
 0x2ba   : > { %1088 = vmatpush.msrb.mxu0 %v1066_v46  ;;  %1108 = vmatpush.msrb.mxu1 %v1067_v48 }
 0x2bb   : > { %v976_v50 = vpop.permute.xlu1 %975  ;;  %v1886_v51 = vpop.permute.xlu2 %1885  ;;  %1760 = vmatmul.msk.f32.vlgmr.msrb.gmra.mxu0 %vm593_vm6, %v1759_v45  ;;  %1757 = vmatmul.msk.f32.vlgmr.msrb.gmra.mxu2 %vm593_vm6, %v1756_v49 }
 0x2bc   : > { %v1888_v52 = vunpack.i.h.bf16 %v1886_v51  ;;  %v1887_v53 = vunpack.i.l.bf16 %v1886_v51  ;;  %v978_v54 = vsel %vm2604_vm4, %v1873_v26, %v976_v50  ;;  %vm540_vm4 = vmand %vm2307_vm9, %vm539_vm8 }
 0x2bd   : > { %1019 = vmatpush.msrb.mxu3 %v978_v54 }
 0x2be   : > { %v1133_v55 = vpop.permute.xlu0 %1132  ;;  %v1223_v56 = vsel %vm1208_vm10, %v1887_v53, %v1888_v52  ;;  %1758 = vmatmul.msk.f32.vlgmr.msrb.gmra.mxu3 %vm593_vm6, %v1756_v49  ;;  %1755 = vmatmul.msk.f32.vlgmr.msra.gmra.mxu1 %vm593_vm6, %v1753_v30 }
 0x2bf   : > { %1245 = vmatpush.msra.mxu0 %v1223_v56 }
 0x2c3   : > { %v1876_v58 = vpop.permute.xlu1 %1875  ;;  %1766 = vmatmul.msk.f32.vlgmr.msra.gmra.mxu0 %vm593_vm6, %v1765_v57  ;;  %v684_v7 = vpop.permute.xlu2 %683 }
 0x2c4   : > { %v1878_v59 = vunpack.i.h.bf16 %v1876_v58  ;;  %v1877_v60 = vunpack.i.l.bf16 %v1876_v58  ;;  %v685_v8 = vrot.slane %v684_v7, 7 }
 0x2c6   : > { %v535_v63 = vpop.permute.xlu0 %534  ;;  %v1134_v0 = vsel %vm1119_vm12, %v1877_v60, %v1878_v59  ;;  %v1135_v47 = vsel %vm1119_vm12, %v1878_v59, %v1133_v55  ;;  %1761 = vmatmul.msk.f32.vlgmr.msrb.gmra.mxu1 %vm593_vm6, %v1759_v45  ;;  %v687_v5 = vsel %vm686_vm14, %v685_v8, %v684_v7  ;;  %vm1586_vm14 = vcmp.lt.s32.totalorder %v509_v20, 256 }
 0x2c7   : > { %v536_v2 = vrot.slane %v535_v63, 7  ;;  %1156 = vmatpush.msra.mxu2 %v1134_v0  ;;  %1176 = vmatpush.msra.mxu3 %v1135_v47 }
 0x2c8   : > { %1763 = vmatmul.msk.f32.vlgmr.msra.gmra.mxu2 %vm593_vm6, %v1762_v61  ;;  %1764 = vmatmul.msk.f32.vlgmr.msra.gmra.mxu3 %vm593_vm6, %v1762_v61 }
 0x2c9   : > { %v537_v4 = vsel %vm505_vm11, %v536_v2, %v535_v63  ;;  %vm2626_vm11 = vcmask 785408  }
 0x2ca   : > { %541 = vst.msk [vmem:[#allocation3] sm:$0x7] %vm540_vm4, %v537_v4 }
 0x2cb   : > { %v1222_v9 = vpop.permute.xlu1 %1221  ;;  %v1031_v17 = vpop.permute.xlu2 %1030 }
 0x2cc   : > { %v1224_v10 = vsel %vm1208_vm10, %v1888_v52, %v1222_v9  ;;  %v1032_v23 = vrot.slane %v1031_v17, 7 }
 0x2cd   : > { %1265 = vmatpush.msra.mxu1 %v1224_v10 }
 0x2ce   : > { %v941_v13 = vpop.permute.xlu0 %940  ;;  %1767 = vmatmul.msk.f32.vlgmr.msra.gmra.mxu1 %vm593_vm6, %v1765_v57  ;;  %v1033_v27 = vsel %vm416_vm0, %v1032_v23, %v1031_v17  ;;  %vm2625_vm0 = vcmask 900096  }
 0x2cf   : > { %v942_v11 = vrot.slane %v941_v13, 7 }
 0x2d1   : > { %v568_v12 = vld [vmem:[#allocation3] sm:$0x7]  ;;  %v944_v21 = vsel %vm943_vm15, %v942_v11, %v941_v13 }
 0x2d2   : > { %571 = vrot.lane.b32.xlu0 %v568_v12, %s2619_s18  ;;  %v689_v14 = vmul.f32 %v687_v5, %v568_v12  ;;  %v777_v18 = vld [vmem:[#allocation3] sm:$0x7]  ;;  %s1781_s18 = sshll.u32 %s2104_s17, 1 }
 0x2d3   : > { %v782_v15 = vpop.permute.xlu1 %781  ;;  %v946_v24 = vmul.f32 %v944_v21, %v777_v18  ;;  %v1026_v26 = vld [vmem:[#allocation3] sm:$0x7] }
 0x2d4   : > { %v783_v16 = vrot.slane %v782_v15, 7  ;;  %710 = vrot.lane.b32.xlu2 %v689_v14, %s2022_s28  ;;  %v1035_v29 = vmul.f32 %v1033_v27, %v1026_v26  ;;  %s2622_s28 = smov 95   ;;  %v543_v43 = vld [vmem:[#allocation3] sm:$0x3] }
 0x2d5   : > { %v557_v49 = vmul.f32 %v2275_v62, %v543_v43 }
 0x2d6   : > { %v785_v19 = vsel %vm784_vm13, %v783_v16, %v782_v15 }
 0x2d7   : > { %v787_v22 = vmul.f32 %v785_v19, %v777_v18 }
 0x2d9   : > { %802 = vrot.lane.b32.xlu1 %v787_v22, %s2620_s21 }
 0x2da   : > { %870 = vrot.lane.b32.xlu0 %v777_v18, %s2621_s29  ;;  %s1622_s29 = scalar_lea.hbm %s2598_s10, %s1781_s18 }
 0x2db   : > { %v1187_v25 = vpop.permute.xlu1 %1186 }
 0x2dc   : > { %v1188_v28 = vrot.slane %v1187_v25, 7  ;;  %959 = vrot.lane.b32.xlu2 %v946_v24, %s2024_s26 }
 0x2de   : > { %v1190_v30 = vsel %vm1189_vm1, %v1188_v28, %v1187_v25 }
 0x2df   : > { %v1192_v31 = vmul.f32 %v1190_v30, %v1026_v26 }
 0x2e1   : > { %1048 = vrot.lane.b32.xlu1 %v1035_v29, %s2023_s25  ;;  %s1624_s25 = sshll.u32 %s2416_s11, 4  ;;  %s1625_s25 = int_to_ptr.vmem [resolvable:$true] %s1624_s25 }
 0x2e2   : > { %1116 = vrot.lane.b32.xlu0 %v1026_v26, %s2622_s28  ;;  %s1595_s28 = scalar_lea.sflag [#allocation7], %s2403_s20 }
 0x2e4   : > { %1205 = vrot.lane.b32.xlu2 %v1192_v31, %s2026_s27  ;;  %s1626_s27 = sshll.u32 %s1622_s29, 4  ;;  %s1627_s27 = int_to_ptr.hbm [resolvable:$true] %s1626_s27 }
 0x2e5   : > { %s1928_s30 = sshra.s32 %s1627_s27, 4  ;;  %s1929_s30 = int_to_ptr.hbm [resolvable:$true] %s1928_s30 }
 0x2e6   : > { %s1930_s0 = scalar_lea.hbm %s1929_s30, 2  ;;  %p1935_p0 = scmp.lt.s32.totalorder %s1929_s30, %s2598_s10 }
 0x2e7   : > { %p1931_p11 = scmp.ne.s32.totalorder %s1929_s30, %s1930_s0  ;;  %p1936_p1 = scmp.lt.s32.totalorder %s1934_s3, %s1930_s0 }
 0x2e9   : > { %1286 = vperm.xlu1 %1889, %v1283_v32   ;;  %p1932_p12 = pnand %p1931_p11, %p2121_p5  ;;  %p1937_p2 = por %p1936_p1, %p1935_p0 }
 0x2eb   : > { %p1933_p13 = pneg %p1932_p12 }
 0x2ed   : > { %p1938_p3 = pnand %p1937_p2, %p1933_p13 }
 0x2f1   : > { %1347 = vperm.xlu1 %1889, %v1341_v33  }
 0x2f9   : > { %1352 = vperm.xlu1 %1889, %v1342_v34  }
 0x301   : > { %1357 = vperm.xlu1 %1889, %v1343_v35  }
 0x309   : > { %1362 = vperm.xlu1 %1889, %v1344_v36  }
 0x315   : > { %v614_v37 = vpop.f32.mrf.mxu0  ;;  %v634_v38 = vpop.f32.mrf.mxu1 }
 0x31d   : > { %v657_v40 = vpop.f32.mrf.mxu0  ;;  %v677_v41 = vpop.f32.mrf.mxu1 }
 0x31e   : > { %v658_v55 = vadd.f32 %v657_v40, %v614_v37  ;;  %v678_v56 = vadd.f32 %v677_v41, %v634_v38 }
 0x325   : > { %v752_v46 = vpop.f32.mrf.mxu0 }
 0x326   : > { %v775_v4 = vadd.f32 %v752_v46, %v658_v55 }
 0x32d   : > { %v912_v9 = vpop.f32.mrf.mxu0 }
 0x32e   : > { %v711_v42 = vpop.permute.xlu2 %710 }
 0x32f   : > { %v712_v51 = vrot.slane %v711_v42, 1 }
 0x331   : > { %v714_v57 = vsel %vm713_vm7, %v711_v42, %v712_v51 }
 0x333   : > { %v772_v48 = vpop.f32.mrf.mxu1 }
 0x334   : > { %v776_v7 = vadd.f32 %v772_v48, %v678_v56 }
 0x335   : > { %v844_v60 = vpop.f32.mrf.mxu2  ;;  %v864_v61 = vpop.f32.mrf.mxu3 }
 0x336   : > { %v960_v52 = vpop.permute.xlu2 %959  ;;  %v867_v11 = vadd.f32 %v844_v60, %v775_v4  ;;  %v868_v15 = vadd.f32 %v864_v61, %v776_v7 }
 0x337   : > { %v961_v8 = vrot.slane %v960_v52, 1 }
 0x338   : > { %v935_v27 = vadd.f32 %v912_v9, %v867_v11  ;;  %v1090_v31 = vpop.f32.mrf.mxu0 }
 0x339   : > { %v963_v14 = vsel %vm2625_vm0, %v960_v52, %v961_v8 }
 0x33b   : > { %v932_v10 = vpop.f32.mrf.mxu1 }
 0x33c   : > { %v936_v28 = vadd.f32 %v932_v10, %v868_v15 }
 0x33e   : > { %v1206_v13 = vpop.permute.xlu2 %1205  ;;  %v1001_v23 = vpop.f32.mrf.mxu2 }
 0x33f   : > { %v1207_v21 = vrot.slane %v1206_v13, 1  ;;  %v1024_v34 = vadd.f32 %v1001_v23, %v935_v27 }
 0x341   : > { %v1021_v24 = vpop.f32.mrf.mxu3  ;;  %v1209_v30 = vsel %vm1208_vm10, %v1206_v13, %v1207_v21  ;;  %v1113_v38 = vadd.f32 %v1090_v31, %v1024_v34  ;;  %v1332_v34 = vld [vmem:[%s2631_s4 + $0x10] sm:$0xff] }
 0x342   : > { %v1025_v35 = vadd.f32 %v1021_v24, %v936_v28 }
 0x343   : > { %v1110_v32 = vpop.f32.mrf.mxu1 }
 0x344   : > { %v572_v44 = vpop.permute.xlu0 %571  ;;  %v1114_v40 = vadd.f32 %v1110_v32, %v1025_v35  ;;  %v1330_v32 = vld [vmem:[%s2631_s4] sm:$0xff]  ;;  %v1333_v35 = vld [vmem:[%s2631_s4 + $0x18] sm:$0xff] }
 0x345   : > { %v573_v45 = vrot.slane %v572_v44, 1 }
 0x347   : > { %v575_v50 = vsel %vm574_vm5, %v572_v44, %v573_v45 }
 0x348   : > { %v577_v53 = vadd.f32 %v575_v50, %v557_v49  ;;  %v1247_v50 = vpop.f32.mrf.mxu0 }
 0x34a   : > { %v716_v63 = vadd.f32 %v714_v57, %v577_v53 }
 0x34b   : > { %v803_v54 = vpop.permute.xlu1 %802  ;;  %v1158_v42 = vpop.f32.mrf.mxu2 }
 0x34c   : > { %v804_v58 = vrot.slane %v803_v54, 1  ;;  %v871_v59 = vpop.permute.xlu0 %870  ;;  %v1178_v43 = vpop.f32.mrf.mxu3  ;;  %v1181_v45 = vadd.f32 %v1158_v42, %v1113_v38 }
 0x34d   : > { %v872_v0 = vrot.slane %v871_v59, 1  ;;  %v1182_v46 = vadd.f32 %v1178_v43, %v1114_v40  ;;  %v1267_v51 = vpop.f32.mrf.mxu1 }
 0x34e   : > { %v806_v47 = vsel %vm805_vm3, %v803_v54, %v804_v58 }
 0x34f   : > { %v808_v2 = vadd.f32 %v806_v47, %v716_v63  ;;  %v874_v62 = vsel %vm873_vm2, %v871_v59, %v872_v0  ;;  %v1271_v53 = vadd.f32 %v1267_v51, %v1182_v46 }
 0x351   : > { %v876_v5 = vadd.f32 %v874_v62, %v808_v2 }
 0x353   : > { %v1049_v12 = vpop.permute.xlu1 %1048  ;;  %v965_v18 = vadd.f32 %v963_v14, %v876_v5 }
 0x354   : > { %v1050_v16 = vrot.slane %v1049_v12, 1  ;;  %v1117_v17 = vpop.permute.xlu0 %1116 }
 0x355   : > { %v1118_v19 = vrot.slane %v1117_v17, 1 }
 0x356   : > { %v1052_v22 = vsel %vm2626_vm11, %v1049_v12, %v1050_v16 }
 0x357   : > { %v1054_v25 = vadd.f32 %v1052_v22, %v965_v18  ;;  %v1120_v26 = vsel %vm1119_vm12, %v1117_v17, %v1118_v19 }
 0x359   : > { %v1122_v29 = vadd.f32 %v1120_v26, %v1054_v25 }
 0x35b   : > { %v1211_v33 = vadd.f32 %v1209_v30, %v1122_v29  ;;  %v1287_v59 = vpop.permute.xlu1 %1286 }
 0x35d   : > { %vm1272_vm13 = vcmp.gt.f32.partialorder %v1211_v33, 0.0 }
 0x35e   : > { %v1273_v36 = vsel %vm1272_vm13, %v1211_v33, 1.0  ;;  %v2408_v37 = vsel %vm1272_vm13, 1.0, %v2018_v6  ;;  %v1291_v6 = vsel %vm1272_vm13, 1, %v2010_v1  ;;  %v1331_v33 = vld [vmem:[%s2631_s4 + $0x8] sm:$0xff] }
 0x35f   : > { %1894 = vrcp.f32 %v1273_v36  ;;  %v1583_v41 = vadd.f32 %v2408_v37, %v2147_v3  ;;  %v1270_v3 = vadd.f32 %v1247_v50, %v1181_v45  ;;  %v1292_v56 = vperm.slane %v1291_v6, 0 }
 0x360   : > { %v1293_v20 = vperm.slane %v1291_v6, 1  ;;  %v1335_v26 = vperm.slane %v2408_v37, 0  ;;  %v1336_v27 = vperm.slane %v2408_v37, 1 }
 0x361   : > { %v1584_v44 = vmax.f32 %v1583_v41, 0.0  ;;  %vm2419_vm15 = vcmp.eq.s32.totalorder %v1292_v56, 1 }
 0x362   : > { %vm2423_vm1 = vcmp.eq.s32.totalorder %v1293_v20, 1 }
 0x363   : > { %v1585_v48 = vmin.f32 %v1584_v44, 1.0  ;;  %v1348_v36 = vpop.permute.xlu1 %1347 }
 0x365   : > { %v1895_v49 = vpop.eup %1894  ;;  %1588 = vst.msk [vmem:[%s2416_s11] sm:$0x3] %vm1586_vm14, %v1585_v48 }
 0x366   : > { %v1275_v52 = vmul.f32 9.0, %v1895_v49 }
 0x368   : > { %v1277_v54 = vperm.slane %v1275_v52, 0  ;;  %v1278_v55 = vperm.slane %v1275_v52, 1 }
 0x36a   : > { %v1281_v57 = vmul.f32 %v1277_v54, %v1270_v3  ;;  %v1282_v58 = vmul.f32 %v1278_v55, %v1271_v53 }
 0x36b   : > { %v1353_v42 = vpop.permute.xlu1 %1352 }
 0x36c   : > { %v1289_v60 = vadd.f32 %v1287_v59, %v1281_v57  ;;  %v1290_v61 = vadd.f32 %v1287_v59, %v1282_v58 }
 0x36e   : > { %v1296_v0 = vsel %vm2419_vm15, %v1289_v60, 0.0  ;;  %v1297_v47 = vsel %vm2423_vm1, %v1290_v61, 0.0 }
 0x36f   : > { %v1298_v2 = vadd.f32 %v1297_v47, %v1296_v0 }
 0x371   : > { %1299 = vadd.xlane.f32.xlu0 %v1298_v2 }
 0x373   : > { %v1358_v3 = vpop.permute.xlu1 %1357 }
 0x37b   : > { %v1363_v59 = vpop.permute.xlu1 %1362 }
 0x3e4   : > { %v1300_v62 = vpop.xlane.xlu0 %1299 }
 0x3e5   : > { %v1301_v4 = vmul.f32 %v1300_v62, %v2177_v39 }
 0x3e7   : > { %v1302_v7 = vsub.f32 %v1296_v0, %v1301_v4  ;;  %v1303_v8 = vsub.f32 %v1297_v47, %v1301_v4 }
 0x3e9   : > { %v1304_v9 = vmul.f32 %v1302_v7, %v1302_v7  ;;  %v1305_v10 = vmul.f32 %v1303_v8, %v1303_v8 }
 0x3eb   : > { %v1306_v5 = vadd.f32 %v1305_v10, %v1304_v9 }
 0x3ed   : > { %1307 = vadd.xlane.f32.xlu2 %v1306_v5 }
 0x460   : > { %v1308_v13 = vpop.xlane.xlu2 %1307 }
 0x461   : > { %v1309_v12 = vmul.f32 %v1308_v13, %v2177_v39 }
 0x463   : > { %v1310_v14 = vadd.f32 1e-05, %v1309_v12 }
 0x465   : > { %1896 = vrsqrt.f32 %v1310_v14  ;;  %vm1317_vm7 = vweird.f32 %v1310_v14 }
 0x46b   : > { %v1897_v11 = vpop.eup %1896 }
 0x46c   : > { %v1312_v15 = vmul.f32 %v1897_v11, %v1310_v14  ;;  %vm1318_vm5 = vweird.f32 %v1897_v11 }
 0x46d   : > { %vm1319_vm9 = vmor %vm1317_vm7, %vm1318_vm5 }
 0x46e   : > { %v1313_v16 = vmul.f32 %v1897_v11, %v1312_v15 }
 0x470   : > { %v1314_v17 = vmul.f32 0.5, %v1313_v16 }
 0x472   : > { %v1315_v18 = vsub.f32 1.5, %v1314_v17 }
 0x474   : > { %v1316_v19 = vmul.f32 %v1897_v11, %v1315_v18 }
 0x476   : > { %v1320_v21 = vsel %vm1319_vm9, %v1897_v11, %v1316_v19 }
 0x477   : > { %v1321_v22 = vmul.f32 %v1320_v21, %v1302_v7  ;;  %v1322_v23 = vmul.f32 %v1320_v21, %v1303_v8 }
 0x479   : > { %vm1323_vm2 = vcmp.ge.f32.partialorder %v1321_v22, 0.0  ;;  %v1325_v24 = vmul.f32 0.1, %v1321_v22  ;;  %vm1324_vm3 = vcmp.ge.f32.partialorder %v1322_v23, 0.0  ;;  %v1326_v25 = vmul.f32 0.1, %v1322_v23 }
 0x47b   : > { %v1327_v28 = vsel %vm1323_vm2, %v1321_v22, %v1325_v24  ;;  %v1328_v29 = vsel %vm1324_vm3, %v1322_v23, %v1326_v25 }
 0x47c   : > { %v1339_v30 = vmul.f32 %v1335_v26, %v1327_v28  ;;  %v1340_v31 = vmul.f32 %v1336_v27, %v1328_v29 }
 0x47e   : > { %1392 = vmatpush.msrb.mxu2 %v1339_v30  ;;  %1421 = vmatpush.msrb.mxu3 %v1340_v31 }
 0x47f   : > { %1769 = vmatmul.msk.f32.vlgmr.msrb.gmra.mxu2 %vm593_vm6, %v1330_v32  ;;  %1773 = vmatmul.msk.f32.vlgmr.msrb.gmra.mxu3 %vm593_vm6, %v1330_v32 }
 0x487   : > { %1770 = vmatmul.msk.f32.gmra.mxu2 %vm593_vm6, %v1331_v33  ;;  %1774 = vmatmul.msk.f32.gmra.mxu3 %vm593_vm6, %v1331_v33 }
 0x48f   : > { %1771 = vmatmul.msk.f32.gmra.mxu2 %vm593_vm6, %v1332_v34  ;;  %1775 = vmatmul.msk.f32.gmra.mxu3 %vm593_vm6, %v1332_v34 }
 0x497   : > { %1772 = vmatmul.msk.f32.gmra.mxu2 %vm593_vm6, %v1333_v35  ;;  %1776 = vmatmul.msk.f32.gmra.mxu3 %vm593_vm6, %v1333_v35 }
 0x502   : > { %v1394_v37 = vpop.f32.mrf.mxu2  ;;  %v1423_v38 = vpop.f32.mrf.mxu3 }
 0x503   : > { %v1395_v40 = vadd.f32 %v1394_v37, %v1348_v36  ;;  %v1424_v41 = vadd.f32 %v1423_v38, %v1348_v36 }
 0x505   : > { %v1435_v43 = vsel %vm2419_vm15, %v1395_v40, 0.0  ;;  %v1436_v44 = vsel %vm2423_vm1, %v1424_v41, 0.0 }
 0x506   : > { %v1443_v45 = vadd.f32 %v1436_v44, %v1435_v43 }
 0x508   : > { %1444 = vadd.xlane.f32.xlu1 %v1443_v45 }
 0x50a   : > { %v1397_v46 = vpop.f32.mrf.mxu2  ;;  %v1426_v48 = vpop.f32.mrf.mxu3 }
 0x50b   : > { %v1398_v49 = vadd.f32 %v1397_v46, %v1353_v42  ;;  %v1427_v50 = vadd.f32 %v1426_v48, %v1353_v42 }
 0x50d   : > { %v1437_v51 = vsel %vm2419_vm15, %v1398_v49, 0.0  ;;  %v1438_v6 = vsel %vm2423_vm1, %v1427_v50, 0.0 }
 0x50e   : > { %v1446_v52 = vadd.f32 %v1438_v6, %v1437_v51 }
 0x510   : > { %1447 = vadd.xlane.f32.xlu0 %v1446_v52 }
 0x512   : > { %v1400_v53 = vpop.f32.mrf.mxu2  ;;  %v1429_v54 = vpop.f32.mrf.mxu3 }
 0x513   : > { %v1401_v55 = vadd.f32 %v1400_v53, %v1358_v3  ;;  %v1430_v56 = vadd.f32 %v1429_v54, %v1358_v3 }
 0x515   : > { %v1439_v20 = vsel %vm2419_vm15, %v1401_v55, 0.0  ;;  %v1440_v57 = vsel %vm2423_vm1, %v1430_v56, 0.0 }
 0x516   : > { %v1449_v58 = vadd.f32 %v1440_v57, %v1439_v20 }
 0x518   : > { %1450 = vadd.xlane.f32.xlu2 %v1449_v58 }
 0x51a   : > { %v1403_v60 = vpop.f32.mrf.mxu2  ;;  %v1432_v61 = vpop.f32.mrf.mxu3 }
 0x51b   : > { %v1404_v0 = vadd.f32 %v1403_v60, %v1363_v59  ;;  %v1433_v47 = vadd.f32 %v1432_v61, %v1363_v59 }
 0x51d   : > { %v1441_v2 = vsel %vm2419_vm15, %v1404_v0, 0.0  ;;  %v1442_v62 = vsel %vm2423_vm1, %v1433_v47, 0.0 }
 0x51e   : > { %v1452_v4 = vadd.f32 %v1442_v62, %v1441_v2 }
 0x520   : > { %1453 = vadd.xlane.f32.xlu0 %v1452_v4 }
 0x57b   : > { %v1445_v7 = vpop.xlane.xlu1 %1444 }
 0x57c   : > { %v1455_v8 = vmul.f32 %v1445_v7, %v2177_v39 }
 0x57e   : > { %v2472_v9 = vsub.f32 %v1435_v43, %v1455_v8  ;;  %v2474_v10 = vsub.f32 %v1436_v44, %v1455_v8 }
 0x580   : > { %v1467_v5 = vmul.f32 %v2472_v9, %v2472_v9  ;;  %v1468_v13 = vmul.f32 %v2474_v10, %v2474_v10 }
 0x582   : > { %v1475_v63 = vadd.f32 %v1468_v13, %v1467_v5 }
 0x583   : > { %v1448_v12 = vpop.xlane.xlu0 %1447 }
 0x584   : > { %v1456_v1 = vmul.f32 %v1448_v12, %v2177_v39  ;;  %1476 = vadd.xlane.f32.xlu2 %v1475_v63 }
 0x586   : > { %v2481_v14 = vsub.f32 %v1437_v51, %v1456_v1  ;;  %v2483_v11 = vsub.f32 %v1438_v6, %v1456_v1 }
 0x588   : > { %v1469_v15 = vmul.f32 %v2481_v14, %v2481_v14  ;;  %v1470_v16 = vmul.f32 %v2483_v11, %v2483_v11 }
 0x58a   : > { %v1478_v17 = vadd.f32 %v1470_v16, %v1469_v15 }
 0x58b   : > { %v1451_v18 = vpop.xlane.xlu2 %1450 }
 0x58c   : > { %v1457_v19 = vmul.f32 %v1451_v18, %v2177_v39  ;;  %1479 = vadd.xlane.f32.xlu0 %v1478_v17 }
 0x58e   : > { %v2490_v21 = vsub.f32 %v1439_v20, %v1457_v19  ;;  %v2492_v22 = vsub.f32 %v1440_v57, %v1457_v19 }
 0x590   : > { %v1471_v23 = vmul.f32 %v2490_v21, %v2490_v21  ;;  %v1472_v24 = vmul.f32 %v2492_v22, %v2492_v22 }
 0x592   : > { %v1481_v25 = vadd.f32 %v1472_v24, %v1471_v23 }
 0x593   : > { %v1454_v26 = vpop.xlane.xlu0 %1453 }
 0x594   : > { %v1458_v27 = vmul.f32 %v1454_v26, %v2177_v39  ;;  %1482 = vadd.xlane.f32.xlu2 %v1481_v25 }
 0x596   : > { %v2499_v28 = vsub.f32 %v1441_v2, %v1458_v27  ;;  %v2501_v29 = vsub.f32 %v1442_v62, %v1458_v27 }
 0x598   : > { %v1473_v30 = vmul.f32 %v2499_v28, %v2499_v28  ;;  %v1474_v31 = vmul.f32 %v2501_v29, %v2501_v29 }
 0x59a   : > { %v1484_v32 = vadd.f32 %v1474_v31, %v1473_v30 }
 0x59c   : > { %1485 = vadd.xlane.f32.xlu0 %v1484_v32 }
 0x59d   : > { %1941 = shalt.err (!%p1938_p3)
}
 0x59e   : > { %1787 = dma.vmem_to_hbm [thread:$0]  (%p2121_p5), %s1625_s25, 32, %s1627_s27, %s1595_s28   ;;  %v1906_v56 = vld [vmem:[%s2141_s12] sm:$0xff]  ;;  %v1907_v57 = vld [vmem:[%s2141_s12 + $0x8] sm:$0xff]  ;;  %v1908_v63 = vld [vmem:[%s2141_s12 + $0x10] sm:$0xff] }
 0x59f   : > { %s1735_s0 = sshll.u32 %s2403_s20, 6  ;;  %v1909_v1 = vld [vmem:[%s2141_s12 + $0x18] sm:$0xff]  ;;  %v1910_v31 = vld [vmem:[%s2141_s12 + $0x20] sm:$0xff]  ;;  %s1785_s2 = sshll.u32 %s2104_s17, 6 }
 0x5a0   : > { %s2532_s1 = scalar_lea.vmem [#allocation4], %s1735_s0  ;;  %s1606_s5 = scalar_lea.hbm %s2597_s9, %s1785_s2 }
 0x5a1   : > { %s1607_s11 = sshll.u32 %s2532_s1, 4  ;;  %s1609_s17 = sshll.u32 %s1606_s5, 4  ;;  %s1608_s11 = int_to_ptr.vmem [resolvable:$true] %s1607_s11  ;;  %s1610_s17 = int_to_ptr.hbm [resolvable:$true] %s1609_s17 }
 0x5a2   : > { %s1590_s18 = scalar_lea.sflag [#allocation5], %s2403_s20  ;;  %s1956_s21 = sshra.s32 %s1610_s17, 4  ;;  %s1957_s21 = int_to_ptr.hbm [resolvable:$true] %s1956_s21 }
 0x5a3   : > { %s1958_s26 = scalar_lea.hbm %s1957_s21, 64  ;;  %s1962_s25 = scalar_lea.hbm %s2597_s9, 128 }
 0x5a4   : > { %p1959_p4 = scmp.ne.s32.totalorder %s1957_s21, %s1958_s26  ;;  %p1963_p9 = scmp.lt.s32.totalorder %s1957_s21, %s2597_s9 }
 0x5a5   : > { %p1964_p10 = scmp.lt.s32.totalorder %s1962_s25, %s1958_s26 }
 0x5a6   : > { %p1960_p7 = pnand %p1959_p4, %p2121_p5 }
 0x5a7   : > { %p1965_p11 = por %p1964_p10, %p1963_p9 }
 0x5a8   : > { %p1961_p8 = pneg %p1960_p7 }
 0x5aa   : > { %p1966_p12 = pnand %p1965_p11, %p1961_p8 }
 0x5f7   : > { %v1477_v33 = vpop.xlane.xlu2 %1476 }
 0x5f8   : > { %v1487_v34 = vmul.f32 %v1477_v33, %v2177_v39  ;;  %v1911_v33 = vld [vmem:[%s2141_s12 + $0x28] sm:$0xff] }
 0x5fa   : > { %v1491_v35 = vadd.f32 1e-05, %v1487_v34 }
 0x5fc   : > { %1898 = vrsqrt.f32 %v1491_v35  ;;  %vm1501_vm4 = vweird.f32 %v1491_v35 }
 0x5ff   : > { %v1480_v36 = vpop.xlane.xlu0 %1479 }
 0x600   : > { %v1488_v37 = vmul.f32 %v1480_v36, %v2177_v39 }
 0x602   : > { %v1899_v38 = vpop.eup %1898  ;;  %v1492_v40 = vadd.f32 1e-05, %v1488_v37 }
 0x603   : > { %v1496_v41 = vmul.f32 %v1899_v38, %v1491_v35  ;;  %vm1502_vm6 = vweird.f32 %v1899_v38 }
 0x604   : > { %1900 = vrsqrt.f32 %v1492_v40  ;;  %vm1503_vm8 = vmor %vm1501_vm4, %vm1502_vm6  ;;  %vm1511_vm11 = vweird.f32 %v1492_v40 }
 0x605   : > { %v1497_v42 = vmul.f32 %v1899_v38, %v1496_v41 }
 0x607   : > { %v1498_v43 = vmul.f32 0.5, %v1497_v42  ;;  %v1483_v44 = vpop.xlane.xlu2 %1482 }
 0x608   : > { %v1489_v45 = vmul.f32 %v1483_v44, %v2177_v39  ;;  %v1912_v44 = vld [vmem:[%s2141_s12 + $0x30] sm:$0xff] }
 0x609   : > { %v1499_v46 = vsub.f32 1.5, %v1498_v43 }
 0x60a   : > { %v1901_v48 = vpop.eup %1900  ;;  %v1493_v49 = vadd.f32 1e-05, %v1489_v45 }
 0x60b   : > { %v1500_v50 = vmul.f32 %v1899_v38, %v1499_v46  ;;  %v1506_v51 = vmul.f32 %v1901_v48, %v1492_v40  ;;  %vm1512_vm10 = vweird.f32 %v1901_v48  ;;  %v1913_v46 = vld [vmem:[%s2141_s12 + $0x38] sm:$0xff] }
 0x60c   : > { %1902 = vrsqrt.f32 %v1493_v49  ;;  %vm1513_vm13 = vmor %vm1511_vm11, %vm1512_vm10  ;;  %vm1521_vm5 = vweird.f32 %v1493_v49 }
 0x60d   : > { %v1504_v6 = vsel %vm1503_vm8, %v1899_v38, %v1500_v50  ;;  %v1507_v52 = vmul.f32 %v1901_v48, %v1506_v51 }
 0x60e   : > { %v1535_v3 = vmul.f32 %v1504_v6, %v2472_v9  ;;  %v1536_v53 = vmul.f32 %v1504_v6, %v2474_v10 }
 0x60f   : > { %v1508_v54 = vmul.f32 0.5, %v1507_v52  ;;  %v1486_v55 = vpop.xlane.xlu0 %1485 }
 0x610   : > { %v1543_v20 = vadd.f32 %v1906_v56, %v1535_v3  ;;  %v1544_v58 = vadd.f32 %v1907_v57, %v1536_v53  ;;  %v1490_v59 = vmul.f32 %v1486_v55, %v2177_v39 }
 0x611   : > { %v1509_v60 = vsub.f32 1.5, %v1508_v54 }
 0x612   : > { %v1903_v61 = vpop.eup %1902  ;;  %vm1551_vm12 = vcmp.ge.f32.partialorder %v1543_v20, 0.0  ;;  %vm1552_vm0 = vcmp.ge.f32.partialorder %v1544_v58, 0.0  ;;  %v1559_v0 = vmul.f32 0.1, %v1543_v20  ;;  %v1560_v47 = vmul.f32 0.1, %v1544_v58 }
 0x613   : > { %v1510_v2 = vmul.f32 %v1901_v48, %v1509_v60  ;;  %v1516_v62 = vmul.f32 %v1903_v61, %v1493_v49  ;;  %v1494_v4 = vadd.f32 1e-05, %v1490_v59  ;;  %vm1522_vm14 = vweird.f32 %v1903_v61 }
 0x614   : > { %v1567_v7 = vsel %vm1551_vm12, %v1543_v20, %v1559_v0  ;;  %v1568_v8 = vsel %vm1552_vm0, %v1544_v58, %v1560_v47  ;;  %vm1523_vm7 = vmor %vm1521_vm5, %vm1522_vm14 }
 0x615   : > { %1575 = vst [vmem:[%s2532_s1] sm:$0xff] %v1567_v7  ;;  %v1514_v39 = vsel %vm1513_vm13, %v1901_v48, %v1510_v2  ;;  %v1517_v9 = vmul.f32 %v1903_v61, %v1516_v62  ;;  %1904 = vrsqrt.f32 %v1494_v4  ;;  %vm1531_vm6 = vweird.f32 %v1494_v4 }
 0x616   : > { %1576 = vst [vmem:[%s2532_s1 + $0x8] sm:$0xff] %v1568_v8  ;;  %v1537_v10 = vmul.f32 %v1514_v39, %v2481_v14  ;;  %v1538_v5 = vmul.f32 %v1514_v39, %v2483_v11 }
 0x617   : > { %v1518_v13 = vmul.f32 0.5, %v1517_v9 }
 0x618   : > { %v1545_v12 = vadd.f32 %v1908_v63, %v1537_v10  ;;  %v1546_v15 = vadd.f32 %v1909_v1, %v1538_v5 }
 0x619   : > { %v1519_v16 = vsub.f32 1.5, %v1518_v13 }
 0x61a   : > { %vm1553_vm15 = vcmp.ge.f32.partialorder %v1545_v12, 0.0  ;;  %vm1554_vm1 = vcmp.ge.f32.partialorder %v1546_v15, 0.0  ;;  %v1561_v17 = vmul.f32 0.1, %v1545_v12  ;;  %v1562_v18 = vmul.f32 0.1, %v1546_v15 }
 0x61b   : > { %v1905_v19 = vpop.eup %1904  ;;  %v1520_v23 = vmul.f32 %v1903_v61, %v1519_v16 }
 0x61c   : > { %v1569_v14 = vsel %vm1553_vm15, %v1545_v12, %v1561_v17  ;;  %v1570_v11 = vsel %vm1554_vm1, %v1546_v15, %v1562_v18  ;;  %v1526_v24 = vmul.f32 %v1905_v19, %v1494_v4  ;;  %vm1532_vm3 = vweird.f32 %v1905_v19 }
 0x61d   : > { %1577 = vst [vmem:[%s2532_s1 + $0x10] sm:$0xff] %v1569_v14  ;;  %v1524_v25 = vsel %vm1523_vm7, %v1903_v61, %v1520_v23  ;;  %vm1533_vm4 = vmor %vm1531_vm6, %vm1532_vm3 }
 0x61e   : > { %1578 = vst [vmem:[%s2532_s1 + $0x18] sm:$0xff] %v1570_v11  ;;  %v1539_v26 = vmul.f32 %v1524_v25, %v2490_v21  ;;  %v1540_v27 = vmul.f32 %v1524_v25, %v2492_v22  ;;  %v1527_v30 = vmul.f32 %v1905_v19, %v1526_v24 }
 0x620   : > { %v1547_v32 = vadd.f32 %v1910_v31, %v1539_v26  ;;  %v1548_v34 = vadd.f32 %v1911_v33, %v1540_v27  ;;  %v1528_v35 = vmul.f32 0.5, %v1527_v30 }
 0x622   : > { %vm1555_vm9 = vcmp.ge.f32.partialorder %v1547_v32, 0.0  ;;  %vm1556_vm2 = vcmp.ge.f32.partialorder %v1548_v34, 0.0  ;;  %v1563_v36 = vmul.f32 0.1, %v1547_v32  ;;  %v1564_v37 = vmul.f32 0.1, %v1548_v34 }
 0x623   : > { %v1529_v38 = vsub.f32 1.5, %v1528_v35 }
 0x624   : > { %v1571_v21 = vsel %vm1555_vm9, %v1547_v32, %v1563_v36  ;;  %v1572_v40 = vsel %vm1556_vm2, %v1548_v34, %v1564_v37 }
 0x625   : > { %1579 = vst [vmem:[%s2532_s1 + $0x20] sm:$0xff] %v1571_v21  ;;  %v1530_v22 = vmul.f32 %v1905_v19, %v1529_v38 }
 0x626   : > { %1580 = vst [vmem:[%s2532_s1 + $0x28] sm:$0xff] %v1572_v40 }
 0x627   : > { %v1534_v41 = vsel %vm1533_vm4, %v1905_v19, %v1530_v22 }
 0x628   : > { %v1541_v42 = vmul.f32 %v1534_v41, %v2499_v28  ;;  %v1542_v43 = vmul.f32 %v1534_v41, %v2501_v29 }
 0x62a   : > { %v1549_v45 = vadd.f32 %v1912_v44, %v1541_v42  ;;  %v1550_v48 = vadd.f32 %v1913_v46, %v1542_v43 }
 0x62c   : > { %vm1557_vm8 = vcmp.ge.f32.partialorder %v1549_v45, 0.0  ;;  %vm1558_vm10 = vcmp.ge.f32.partialorder %v1550_v48, 0.0  ;;  %v1565_v49 = vmul.f32 0.1, %v1549_v45  ;;  %v1566_v28 = vmul.f32 0.1, %v1550_v48 }
 0x62e   : > { %v1573_v29 = vsel %vm1557_vm8, %v1549_v45, %v1565_v49  ;;  %v1574_v50 = vsel %vm1558_vm10, %v1550_v48, %v1566_v28 }
 0x62f   : > { %1581 = vst [vmem:[%s2532_s1 + $0x30] sm:$0xff] %v1573_v29 }
 0x630   : > { %1582 = vst [vmem:[%s2532_s1 + $0x38] sm:$0xff] %v1574_v50 }
 0x631   : > { %1969 = shalt.err (!%p1966_p12)
}
 0x632   : > { %s2027_s20 = smov 256   ;;  %s2632_s30 = smov 16  }
 0x633   : > { %1786 = dma.vmem_to_hbm [thread:$0]  (%p2121_p5), %s1608_s11, 1024, %s1610_s17, %s1590_s18, %s2027_s20, %s2027_s20, %s2632_s30  }
 0x634 PF: > { %p1797_p13 = scmp.ge.s32.totalorder %s2008_s16, 2  ;;  %s1638_s0 = sand.u32 1, %s1996_s13  }
 0x635   : > { %s1639_s1 = scalar_lea.sflag [#allocation5], %s1638_s0 }
 0x636   : > { %p1791_p0 = pnand %p1797_p13, %p2125_p6 }
 0x638   : > { %p1792_p1 = pneg %p1791_p0 }
 0x63a   : > { %1987 = dma.done.wait (%p1792_p1), %s1639_s1, 1024  }
 0x63b   : > { %1989 = vsyncadd (%p1792_p1), %s1639_s1, 4294966272  ;;  %s1649_s2 = scalar_lea.sflag [#allocation7], %s1638_s0 }
 0x63c   : > { %1991 = dma.done.wait (%p1792_p1), %s1649_s2, 32  }
 0x63d   : > { %1993 = vsyncadd (%p1792_p1), %s1649_s2, 4294967264  ;;  %p24_p5 = scmp.ge.s32.totalorder %s2108_s19, 4   ;;  %s2633_s13 = smov %s2000_s14 }
 0x63e   : > { %s2634_s14 = smov %s2004_s15  ;;  %s2635_s15 = smov %s2119_s22 }
 0x63f   : > { %s2636_s16 = smov %s2108_s19  ;;  %26 = sbr.rel (!%p24_p5) target bundleno = 12 (0xc), region = 122 }
 0x644   :  { %1655 = vsyncpa [#allocation5], 1 }
 0x645   :  { %1657 = vsyncpa [#allocation5 + $0x1], 1 }
 0x646   :  { %1658 = vsyncpa [#allocation7], 1 }
 0x647   :  { %1660 = vsyncpa [#allocation7 + $0x1], 1 }

</bundles_post_ra>
